<compile_context>
chip_gen: v7x
topology: tpu7x:2x2x1
jax: 0.10.0
libtpu: 0.0.40
codegen_flags: <defaults>
</compile_context>

<pallas_src>
import functools

import jax
import jax.numpy as jnp
from jax.experimental import pallas as pl
from jax.experimental.pallas import tpu as pltpu

LANE = 128      # lane tile width
SUBLANE = 8     # f32 sublane tile height (batch padded to a multiple of this)


# ----------------------------------------------------------------------------
# Fused Pallas kernel: stacked LSTM layers + final Linear
# ----------------------------------------------------------------------------
def fused_lstm_fc_kernel(x_ref, wih_ref, whh_ref, b_ref, fcw_ref, fcb_ref,
                         out_ref, xw_s, xin_s, *, hidden_size):
    """Fused stacked-LSTM + FC forward (single invocation, no grid).

    x_ref:   (T*Bp, Kp)  f32   time-major layer-0 input, zero-padded
    wih_ref: (L, Kp, Gp) bf16  W_ih^T per layer, gates packed [i|f|g|o]
    whh_ref: (L, Kp, Gp) bf16  W_hh^T per layer, gates packed (Kp == Gp)
    b_ref:   (L, 1, Gp)  f32   fused bias (b_ih + b_hh), gates packed
    fcw_ref: (Kp, OUTP)  bf16  final Linear weight^T (only col 0 / rows <H real)
    fcb_ref: (1, OUTP)   f32   final Linear bias, zero-padded
    out_ref: (Bp, OUTP)  f32   lane-dense output; real result is [:B, :1]
    xw_s:    (T*Bp, Gp)  f32   scratch: hoisted whole-sequence projection
    xin_s:   (T*Bp, Kp)  f32   scratch: next layer's time-major input

    Lane bookkeeping: h and c are (Bp, Gp) with the *real* state in lanes
    [0, H).  Lanes >= H carry bounded roll garbage which never reaches the
    result because every weight matrix has exact zeros in rows >= H (and >= D
    for layer 0), so 0 * garbage == 0.
    """
    TB, Kp = x_ref.shape
    L, _, Gp = wih_ref.shape
    Bp = out_ref.shape[0]
    T = TB // Bp
    H = hidden_size

    h = jnp.zeros((Bp, Gp), jnp.float32)

    for layer in range(L):                       # static Python loop (L small)
        wih = wih_ref[layer]                     # (Kp, Gp) bf16
        whh = whh_ref[layer]                     # (Kp, Gp) bf16
        bias = b_ref[layer]                      # (1, Gp)  f32

        # Hoisted input projection (+ bias) for the WHOLE sequence: one MXU
        # matmul per layer, written to VMEM scratch (bounds live ranges).
        src = x_ref if layer == 0 else xin_s
        xw_s[...] = (
            jnp.dot(src[...].astype(jnp.bfloat16), wih,
                    preferred_element_type=jnp.float32)
            + bias
        )                                        # (T*Bp, Gp)

        # Recurrence: h, c carried in vregs; loop fully unrolled (T static).
        h = jnp.zeros((Bp, Gp), jnp.float32)
        c = jnp.zeros((Bp, Gp), jnp.float32)
        for t in range(T):
            gates = xw_s[pl.ds(t * Bp, Bp), :] + jnp.dot(
                h.astype(jnp.bfloat16), whh,
                preferred_element_type=jnp.float32)          # (Bp, Gp)

            # Two full-vreg EUP passes instead of four per-gate ones.
            sig = jax.nn.sigmoid(gates)          # i | f | . | o on their lanes
            tnh = jnp.tanh(gates)                # . | . | g | . on its lanes

            # Align f / g / o onto the c/h lanes [0, H) with XLU rotates
            # (np.roll semantics: positive shift moves data to higher lanes,
            #  so shift = Gp - k*H brings lane k*H to lane 0).
            i_al = sig
            f_al = pltpu.roll(sig, Gp - 1 * H, 1)
            g_al = pltpu.roll(tnh, Gp - 2 * H, 1)
            o_al = pltpu.roll(sig, Gp - 3 * H, 1)

            c = f_al * c + i_al * g_al
            h = o_al * jnp.tanh(c)

            if layer < L - 1:
                # Next layer's time-major input, written straight to scratch.
                xin_s[pl.ds(t * Bp, Bp), :] = h

    # Fused FC epilogue on the final hidden state (out[:, -1, :] @ W_fc^T + b).
    out_ref[...] = (
        jnp.dot(h.astype(jnp.bfloat16), fcw_ref[...],
                preferred_element_type=jnp.float32)
        + fcb_ref[...]
    )


# ----------------------------------------------------------------------------
# Parameter padding / stacking (done once, outside the forward pass)
# ----------------------------------------------------------------------------
def prepare_padded_params(layer_params, fc_w_t, fc_b, hidden_size, input_size):
    """Pack gates contiguously, pad to lane tiles, cast weights to bf16."""
    H = hidden_size
    G = 4 * H
    Gp = ((G + LANE - 1) // LANE) * LANE          # packed gate width (128 here)
    Kp = Gp                                       # contraction-dim padding
    assert input_size <= Kp and H <= Kp
    OUTP = LANE

    wih_l, whh_l, b_l = [], [], []
    for (wih_t, whh_t, b) in layer_params:
        d_in = wih_t.shape[0]
        wih_l.append(jnp.pad(wih_t, ((0, Kp - d_in), (0, Gp - G))))  # (Kp, Gp)
        whh_l.append(jnp.pad(whh_t, ((0, Kp - H), (0, Gp - G))))     # (Kp, Gp)
        b_l.append(jnp.pad(b, ((0, 0), (0, Gp - G))))                # (1, Gp)

    wih_all = jnp.stack(wih_l).astype(jnp.bfloat16)                  # (L,Kp,Gp)
    whh_all = jnp.stack(whh_l).astype(jnp.bfloat16)                  # (L,Kp,Gp)
    b_all = jnp.stack(b_l)                                           # (L,1,Gp) f32
    fcw_p = jnp.pad(fc_w_t, ((0, Kp - H), (0, OUTP - 1))).astype(jnp.bfloat16)
    fcb_p = jnp.pad(fc_b, ((0, 0), (0, OUTP - 1)))                   # (1,OUTP) f32
    return wih_all, whh_all, b_all, fcw_p, fcb_p


# ----------------------------------------------------------------------------
# Forward pass (single fused pallas_call)
# ----------------------------------------------------------------------------
@functools.partial(jax.jit, static_argnames=("hidden_size",))
def lstm_model_forward(x, wih_all, whh_all, b_all, fcw_p, fcb_p, *, hidden_size):
    """x: (B, T, D_in) batch-first.  Returns (B, 1), matching the nn.Module."""
    B, T, D = x.shape
    L, Kp, Gp = wih_all.shape
    OUTP = fcw_p.shape[1]
    Bp = ((B + SUBLANE - 1) // SUBLANE) * SUBLANE

    # Layer-0 input: time-major, batch padded to Bp, features padded to Kp,
    # flattened to (T*Bp, Kp) so the whole-sequence projection is one matmul.
    xp = jnp.zeros((T, Bp, Kp), jnp.float32)
    xp = xp.at[:, :B, :D].set(jnp.transpose(x, (1, 0, 2)).astype(jnp.float32))
    xp = xp.reshape(T * Bp, Kp)

    # VMEM sizing & advisory cost estimate from the actual buffers.
    in_bytes = sum(int(a.size) * a.dtype.itemsize
                   for a in (xp, wih_all, whh_all, b_all, fcw_p, fcb_p))
    out_bytes = Bp * OUTP * 4
    scratch_bytes = (T * Bp * Gp + T * Bp * Kp) * 4
    vmem_limit = int(max(8 << 20, 2 * (in_bytes + out_bytes + scratch_bytes)))

    flops = (2 * L * (T * Bp) * Kp * Gp        # hoisted x @ W_ih^T per layer
             + 2 * L * T * Bp * Gp * Gp        # recurrent h @ W_hh^T
             + 2 * Bp * Kp * OUTP)             # fused FC epilogue
    transcendentals = L * T * Bp * Gp * 3      # sigmoid + 2x tanh per step

    vmem = pl.BlockSpec(memory_space=pltpu.MemorySpace.VMEM)
    out_p = pl.pallas_call(
        functools.partial(fused_lstm_fc_kernel, hidden_size=hidden_size),
        out_shape=jax.ShapeDtypeStruct((Bp, OUTP), jnp.float32),
        in_specs=[vmem] * 6,
        out_specs=vmem,
        scratch_shapes=[
            pltpu.VMEM((T * Bp, Gp), jnp.float32),   # xw_s  (hoisted projection)
            pltpu.VMEM((T * Bp, Kp), jnp.float32),   # xin_s (inter-layer input)
        ],
        compiler_params=pltpu.CompilerParams(vmem_limit_bytes=vmem_limit),
        cost_estimate=pl.CostEstimate(flops=flops,
                                      transcendentals=transcendentals,
                                      bytes_accessed=in_bytes + out_bytes),
    )(xp, wih_all, whh_all, b_all, fcw_p, fcb_p)
    return out_p[:B, :1]


# ----------------------------------------------------------------------------
# Pure-JAX reference (correctness check against the PyTorch semantics, f32)
# ----------------------------------------------------------------------------
def reference_forward(x, layer_params, fc_w_t, fc_b):
    B = x.shape[0]
    seq = x  # (B, T, D)
    for (wih_t, whh_t, b) in layer_params:
        H = whh_t.shape[0]
        h = jnp.zeros((B, H), jnp.float32)
        c = jnp.zeros((B, H), jnp.float32)
        outs = []
        for t in range(seq.shape[1]):
            gates = seq[:, t, :] @ wih_t + h @ whh_t + b
            i_g = jax.nn.sigmoid(gates[:, 0 * H:1 * H])
            f_g = jax.nn.sigmoid(gates[:, 1 * H:2 * H])
            g_g = jnp.tanh(gates[:, 2 * H:3 * H])
            o_g = jax.nn.sigmoid(gates[:, 3 * H:4 * H])
            c = f_g * c + i_g * g_g
            h = o_g * jnp.tanh(c)
            outs.append(h)
        seq = jnp.stack(outs, axis=1)
    return seq[:, -1, :] @ fc_w_t + fc_b


# ----------------------------------------------------------------------------
# Deterministic parameter construction (shapes from nn.LSTM / nn.Linear)
# ----------------------------------------------------------------------------
def make_params(key, input_size, hidden_size, num_layers):
    bound = 1.0 / jnp.sqrt(jnp.float32(hidden_size))
    layer_params = []
    for layer in range(num_layers):
        d_in = input_size if layer == 0 else hidden_size
        key, k1, k2, k3, k4 = jax.random.split(key, 5)
        w_ih = jax.random.uniform(k1, (4 * hidden_size, d_in), jnp.float32,
                                  -bound, bound)
        w_hh = jax.random.uniform(k2, (4 * hidden_size, hidden_size), jnp.float32,
                                  -bound, bound)
        b_ih = jax.random.uniform(k3, (4 * hidden_size,), jnp.float32, -bound, bound)
        b_hh = jax.random.uniform(k4, (4 * hidden_size,), jnp.float32, -bound, bound)
        layer_params.append(
            (w_ih.T, w_hh.T, (b_ih + b_hh).reshape(1, 4 * hidden_size))
        )
    key, k5, k6 = jax.random.split(key, 3)
    fc_w = jax.random.uniform(k5, (1, hidden_size), jnp.float32, -bound, bound)
    fc_b = jax.random.uniform(k6, (1,), jnp.float32, -bound, bound)
    return tuple(layer_params), fc_w.T, fc_b.reshape(1, 1)


if __name__ == "__main__":
    # Small shapes consistent with the module's forward:
    # batch=2, seq_len=8, input_size=4, hidden_size=32, num_stacked_layers=2.
    B, T, D_IN, H, L = 2, 8, 4, 32, 2

    key = jax.random.PRNGKey(0)
    key, kx = jax.random.split(key)
    x = jax.random.normal(kx, (B, T, D_IN), jnp.float32)

    layer_params, fc_w_t, fc_b = make_params(key, D_IN, H, L)
    padded = prepare_padded_params(layer_params, fc_w_t, fc_b, H, D_IN)

    out = lstm_model_forward(x, *padded, hidden_size=H)
    out = jax.block_until_ready(out)

    ref = reference_forward(x, layer_params, fc_w_t, fc_b)
    assert out.shape == (B, 1)
    # Tolerance loosened vs. the f32 reference because weights are bf16 on the
    # MXU (f32 accumulation); observed error is O(1e-3) for these shapes.
    assert jnp.allclose(out, ref, atol=1e-2, rtol=1e-2), (out, ref)

    print("KERNEL_OK")
</pallas_src>

<mosaic_0001>
module attributes {stable_mosaic.version = 11 : i64} {
  func.func @fused_lstm_fc_kernel(%arg0: memref<64x128xf32, #tpu.memory_space<vmem>>, %arg1: memref<2x128x128xbf16, #tpu.memory_space<vmem>>, %arg2: memref<2x128x128xbf16, #tpu.memory_space<vmem>>, %arg3: memref<2x1x128xf32, #tpu.memory_space<vmem>>, %arg4: memref<128x128xbf16, #tpu.memory_space<vmem>>, %arg5: memref<1x128xf32, #tpu.memory_space<vmem>>, %arg6: memref<8x128xf32, #tpu.memory_space<vmem>>, %arg7: memref<64x128xf32, #tpu.memory_space<vmem>>, %arg8: memref<64x128xf32, #tpu.memory_space<vmem>>) attributes {dimension_semantics = [], scalar_prefetch = 0 : i64, scratch_operands = 2 : i64, tpu.core_type = #tpu.core_type<tc>} {
    %c0 = arith.constant 0 : index
    %c0_0 = arith.constant 0 : index
    %c0_1 = arith.constant 0 : index
    %0 = vector.load %arg1[%c0, %c0_0, %c0_1] : memref<2x128x128xbf16, #tpu.memory_space<vmem>>, vector<1x128x128xbf16>
    %1 = vector.shape_cast %0 : vector<1x128x128xbf16> to vector<128x128xbf16>
    %c0_2 = arith.constant 0 : index
    %c0_3 = arith.constant 0 : index
    %c0_4 = arith.constant 0 : index
    %2 = vector.load %arg2[%c0_2, %c0_3, %c0_4] : memref<2x128x128xbf16, #tpu.memory_space<vmem>>, vector<1x128x128xbf16>
    %3 = vector.shape_cast %2 : vector<1x128x128xbf16> to vector<128x128xbf16>
    %c0_5 = arith.constant 0 : index
    %c0_6 = arith.constant 0 : index
    %c0_7 = arith.constant 0 : index
    %4 = vector.load %arg3[%c0_5, %c0_6, %c0_7] : memref<2x1x128xf32, #tpu.memory_space<vmem>>, vector<1x1x128xf32>
    %5 = vector.shape_cast %4 : vector<1x1x128xf32> to vector<1x128xf32>
    %c0_8 = arith.constant 0 : index
    %c0_9 = arith.constant 0 : index
    %6 = vector.load %arg0[%c0_8, %c0_9] : memref<64x128xf32, #tpu.memory_space<vmem>>, vector<64x128xf32>
    %7 = arith.truncf %6 : vector<64x128xf32> to vector<64x128xbf16>
    %cst = arith.constant dense<0.000000e+00> : vector<64x128xf32>
    %8 = tpu.matmul %7, %1, %cst {dimension_numbers = #tpu.dot_dimension_numbers<[1], [0], [0], [1], [0, 0, 1, 1], [], []>} : vector<64x128xbf16>, vector<128x128xbf16>, vector<64x128xf32> -> vector<64x128xf32>
    %9 = vector.broadcast %5 : vector<1x128xf32> to vector<64x128xf32>
    %10 = arith.addf %8, %9 : vector<64x128xf32>
    %c0_10 = arith.constant 0 : index
    %c0_11 = arith.constant 0 : index
    %11 = vector.load %arg7[%c0_10, %c0_11] : memref<64x128xf32, #tpu.memory_space<vmem>>, vector<64x128xf32>
    tpu.vector_store %arg7[%c0_10, %c0_11], %10 {strides = array<i32>} : memref<64x128xf32, #tpu.memory_space<vmem>>, vector<64x128xf32>,
    %cst_12 = arith.constant 0.000000e+00 : f32
    %12 = vector.broadcast %cst_12 : f32 to vector<8x128xf32>
    %cst_13 = arith.constant 0.000000e+00 : f32
    %13 = vector.broadcast %cst_13 : f32 to vector<8x128xf32>
    %c0_14 = arith.constant 0 : index
    %c0_15 = arith.constant 0 : index
    %14 = vector.load %arg7[%c0_14, %c0_15] : memref<64x128xf32, #tpu.memory_space<vmem>>, vector<8x128xf32>
    %15 = arith.truncf %12 : vector<8x128xf32> to vector<8x128xbf16>
    %cst_16 = arith.constant dense<0.000000e+00> : vector<8x128xf32>
    %16 = tpu.matmul %15, %3, %cst_16 {dimension_numbers = #tpu.dot_dimension_numbers<[1], [0], [0], [1], [0, 0, 1, 1], [], []>} : vector<8x128xbf16>, vector<128x128xbf16>, vector<8x128xf32> -> vector<8x128xf32>
    %17 = arith.addf %14, %16 : vector<8x128xf32>
    %18 = arith.negf %17 : vector<8x128xf32>
    %19 = math.exp %18 : vector<8x128xf32>
    %cst_17 = arith.constant 1.000000e+00 : f32
    %20 = vector.broadcast %cst_17 : f32 to vector<8x128xf32>
    %21 = arith.addf %20, %19 : vector<8x128xf32>
    %22 = arith.divf %20, %21 : vector<8x128xf32>
    %23 = math.tanh %17 : vector<8x128xf32>
    %c96_i32 = arith.constant 96 : i32
    %24 = tpu.dynamic_rotate %22 by %c96_i32 dim 1 : vector<8x128xf32>, i32 -> vector<8x128xf32>
    %c64_i32 = arith.constant 64 : i32
    %25 = tpu.dynamic_rotate %23 by %c64_i32 dim 1 : vector<8x128xf32>, i32 -> vector<8x128xf32>
    %c32_i32 = arith.constant 32 : i32
    %26 = tpu.dynamic_rotate %22 by %c32_i32 dim 1 : vector<8x128xf32>, i32 -> vector<8x128xf32>
    %27 = arith.mulf %24, %13 : vector<8x128xf32>
    %28 = arith.mulf %22, %25 : vector<8x128xf32>
    %29 = arith.addf %27, %28 : vector<8x128xf32>
    %30 = math.tanh %29 : vector<8x128xf32>
    %31 = arith.mulf %26, %30 : vector<8x128xf32>
    %c0_18 = arith.constant 0 : index
    %c0_19 = arith.constant 0 : index
    %32 = vector.load %arg8[%c0_18, %c0_19] : memref<64x128xf32, #tpu.memory_space<vmem>>, vector<8x128xf32>
    tpu.vector_store %arg8[%c0_18, %c0_19], %31 {strides = array<i32>} : memref<64x128xf32, #tpu.memory_space<vmem>>, vector<8x128xf32>,
    %c8 = arith.constant 8 : index
    %c0_20 = arith.constant 0 : index
    %33 = vector.load %arg7[%c8, %c0_20] : memref<64x128xf32, #tpu.memory_space<vmem>>, vector<8x128xf32>
    %34 = arith.truncf %31 : vector<8x128xf32> to vector<8x128xbf16>
    %cst_21 = arith.constant dense<0.000000e+00> : vector<8x128xf32>
    %35 = tpu.matmul %34, %3, %cst_21 {dimension_numbers = #tpu.dot_dimension_numbers<[1], [0], [0], [1], [0, 0, 1, 1], [], []>} : vector<8x128xbf16>, vector<128x128xbf16>, vector<8x128xf32> -> vector<8x128xf32>
    %36 = arith.addf %33, %35 : vector<8x128xf32>
    %37 = arith.negf %36 : vector<8x128xf32>
    %38 = math.exp %37 : vector<8x128xf32>
    %cst_22 = arith.constant 1.000000e+00 : f32
    %39 = vector.broadcast %cst_22 : f32 to vector<8x128xf32>
    %40 = arith.addf %39, %38 : vector<8x128xf32>
    %41 = arith.divf %39, %40 : vector<8x128xf32>
    %42 = math.tanh %36 : vector<8x128xf32>
    %c96_i32_23 = arith.constant 96 : i32
    %43 = tpu.dynamic_rotate %41 by %c96_i32_23 dim 1 : vector<8x128xf32>, i32 -> vector<8x128xf32>
    %c64_i32_24 = arith.constant 64 : i32
    %44 = tpu.dynamic_rotate %42 by %c64_i32_24 dim 1 : vector<8x128xf32>, i32 -> vector<8x128xf32>
    %c32_i32_25 = arith.constant 32 : i32
    %45 = tpu.dynamic_rotate %41 by %c32_i32_25 dim 1 : vector<8x128xf32>, i32 -> vector<8x128xf32>
    %46 = arith.mulf %43, %29 : vector<8x128xf32>
    %47 = arith.mulf %41, %44 : vector<8x128xf32>
    %48 = arith.addf %46, %47 : vector<8x128xf32>
    %49 = math.tanh %48 : vector<8x128xf32>
    %50 = arith.mulf %45, %49 : vector<8x128xf32>
    %c8_26 = arith.constant 8 : index
    %c0_27 = arith.constant 0 : index
    %51 = vector.load %arg8[%c8_26, %c0_27] : memref<64x128xf32, #tpu.memory_space<vmem>>, vector<8x128xf32>
    tpu.vector_store %arg8[%c8_26, %c0_27], %50 {strides = array<i32>} : memref<64x128xf32, #tpu.memory_space<vmem>>, vector<8x128xf32>,
    %c16 = arith.constant 16 : index
    %c0_28 = arith.constant 0 : index
    %52 = vector.load %arg7[%c16, %c0_28] : memref<64x128xf32, #tpu.memory_space<vmem>>, vector<8x128xf32>
    %53 = arith.truncf %50 : vector<8x128xf32> to vector<8x128xbf16>
    %cst_29 = arith.constant dense<0.000000e+00> : vector<8x128xf32>
    %54 = tpu.matmul %53, %3, %cst_29 {dimension_numbers = #tpu.dot_dimension_numbers<[1], [0], [0], [1], [0, 0, 1, 1], [], []>} : vector<8x128xbf16>, vector<128x128xbf16>, vector<8x128xf32> -> vector<8x128xf32>
    %55 = arith.addf %52, %54 : vector<8x128xf32>
    %56 = arith.negf %55 : vector<8x128xf32>
    %57 = math.exp %56 : vector<8x128xf32>
    %cst_30 = arith.constant 1.000000e+00 : f32
    %58 = vector.broadcast %cst_30 : f32 to vector<8x128xf32>
    %59 = arith.addf %58, %57 : vector<8x128xf32>
    %60 = arith.divf %58, %59 : vector<8x128xf32>
    %61 = math.tanh %55 : vector<8x128xf32>
    %c96_i32_31 = arith.constant 96 : i32
    %62 = tpu.dynamic_rotate %60 by %c96_i32_31 dim 1 : vector<8x128xf32>, i32 -> vector<8x128xf32>
    %c64_i32_32 = arith.constant 64 : i32
    %63 = tpu.dynamic_rotate %61 by %c64_i32_32 dim 1 : vector<8x128xf32>, i32 -> vector<8x128xf32>
    %c32_i32_33 = arith.constant 32 : i32
    %64 = tpu.dynamic_rotate %60 by %c32_i32_33 dim 1 : vector<8x128xf32>, i32 -> vector<8x128xf32>
    %65 = arith.mulf %62, %48 : vector<8x128xf32>
    %66 = arith.mulf %60, %63 : vector<8x128xf32>
    %67 = arith.addf %65, %66 : vector<8x128xf32>
    %68 = math.tanh %67 : vector<8x128xf32>
    %69 = arith.mulf %64, %68 : vector<8x128xf32>
    %c16_34 = arith.constant 16 : index
    %c0_35 = arith.constant 0 : index
    %70 = vector.load %arg8[%c16_34, %c0_35] : memref<64x128xf32, #tpu.memory_space<vmem>>, vector<8x128xf32>
    tpu.vector_store %arg8[%c16_34, %c0_35], %69 {strides = array<i32>} : memref<64x128xf32, #tpu.memory_space<vmem>>, vector<8x128xf32>,
    %c24 = arith.constant 24 : index
    %c0_36 = arith.constant 0 : index
    %71 = vector.load %arg7[%c24, %c0_36] : memref<64x128xf32, #tpu.memory_space<vmem>>, vector<8x128xf32>
    %72 = arith.truncf %69 : vector<8x128xf32> to vector<8x128xbf16>
    %cst_37 = arith.constant dense<0.000000e+00> : vector<8x128xf32>
    %73 = tpu.matmul %72, %3, %cst_37 {dimension_numbers = #tpu.dot_dimension_numbers<[1], [0], [0], [1], [0, 0, 1, 1], [], []>} : vector<8x128xbf16>, vector<128x128xbf16>, vector<8x128xf32> -> vector<8x128xf32>
    %74 = arith.addf %71, %73 : vector<8x128xf32>
    %75 = arith.negf %74 : vector<8x128xf32>
    %76 = math.exp %75 : vector<8x128xf32>
    %cst_38 = arith.constant 1.000000e+00 : f32
    %77 = vector.broadcast %cst_38 : f32 to vector<8x128xf32>
    %78 = arith.addf %77, %76 : vector<8x128xf32>
    %79 = arith.divf %77, %78 : vector<8x128xf32>
    %80 = math.tanh %74 : vector<8x128xf32>
    %c96_i32_39 = arith.constant 96 : i32
    %81 = tpu.dynamic_rotate %79 by %c96_i32_39 dim 1 : vector<8x128xf32>, i32 -> vector<8x128xf32>
    %c64_i32_40 = arith.constant 64 : i32
    %82 = tpu.dynamic_rotate %80 by %c64_i32_40 dim 1 : vector<8x128xf32>, i32 -> vector<8x128xf32>
    %c32_i32_41 = arith.constant 32 : i32
    %83 = tpu.dynamic_rotate %79 by %c32_i32_41 dim 1 : vector<8x128xf32>, i32 -> vector<8x128xf32>
    %84 = arith.mulf %81, %67 : vector<8x128xf32>
    %85 = arith.mulf %79, %82 : vector<8x128xf32>
    %86 = arith.addf %84, %85 : vector<8x128xf32>
    %87 = math.tanh %86 : vector<8x128xf32>
    %88 = arith.mulf %83, %87 : vector<8x128xf32>
    %c24_42 = arith.constant 24 : index
    %c0_43 = arith.constant 0 : index
    %89 = vector.load %arg8[%c24_42, %c0_43] : memref<64x128xf32, #tpu.memory_space<vmem>>, vector<8x128xf32>
    tpu.vector_store %arg8[%c24_42, %c0_43], %88 {strides = array<i32>} : memref<64x128xf32, #tpu.memory_space<vmem>>, vector<8x128xf32>,
    %c32 = arith.constant 32 : index
    %c0_44 = arith.constant 0 : index
    %90 = vector.load %arg7[%c32, %c0_44] : memref<64x128xf32, #tpu.memory_space<vmem>>, vector<8x128xf32>
    %91 = arith.truncf %88 : vector<8x128xf32> to vector<8x128xbf16>
    %cst_45 = arith.constant dense<0.000000e+00> : vector<8x128xf32>
    %92 = tpu.matmul %91, %3, %cst_45 {dimension_numbers = #tpu.dot_dimension_numbers<[1], [0], [0], [1], [0, 0, 1, 1], [], []>} : vector<8x128xbf16>, vector<128x128xbf16>, vector<8x128xf32> -> vector<8x128xf32>
    %93 = arith.addf %90, %92 : vector<8x128xf32>
    %94 = arith.negf %93 : vector<8x128xf32>
    %95 = math.exp %94 : vector<8x128xf32>
    %cst_46 = arith.constant 1.000000e+00 : f32
    %96 = vector.broadcast %cst_46 : f32 to vector<8x128xf32>
    %97 = arith.addf %96, %95 : vector<8x128xf32>
    %98 = arith.divf %96, %97 : vector<8x128xf32>
    %99 = math.tanh %93 : vector<8x128xf32>
    %c96_i32_47 = arith.constant 96 : i32
    %100 = tpu.dynamic_rotate %98 by %c96_i32_47 dim 1 : vector<8x128xf32>, i32 -> vector<8x128xf32>
    %c64_i32_48 = arith.constant 64 : i32
    %101 = tpu.dynamic_rotate %99 by %c64_i32_48 dim 1 : vector<8x128xf32>, i32 -> vector<8x128xf32>
    %c32_i32_49 = arith.constant 32 : i32
    %102 = tpu.dynamic_rotate %98 by %c32_i32_49 dim 1 : vector<8x128xf32>, i32 -> vector<8x128xf32>
    %103 = arith.mulf %100, %86 : vector<8x128xf32>
    %104 = arith.mulf %98, %101 : vector<8x128xf32>
    %105 = arith.addf %103, %104 : vector<8x128xf32>
    %106 = math.tanh %105 : vector<8x128xf32>
    %107 = arith.mulf %102, %106 : vector<8x128xf32>
    %c32_50 = arith.constant 32 : index
    %c0_51 = arith.constant 0 : index
    %108 = vector.load %arg8[%c32_50, %c0_51] : memref<64x128xf32, #tpu.memory_space<vmem>>, vector<8x128xf32>
    tpu.vector_store %arg8[%c32_50, %c0_51], %107 {strides = array<i32>} : memref<64x128xf32, #tpu.memory_space<vmem>>, vector<8x128xf32>,
    %c40 = arith.constant 40 : index
    %c0_52 = arith.constant 0 : index
    %109 = vector.load %arg7[%c40, %c0_52] : memref<64x128xf32, #tpu.memory_space<vmem>>, vector<8x128xf32>
    %110 = arith.truncf %107 : vector<8x128xf32> to vector<8x128xbf16>
    %cst_53 = arith.constant dense<0.000000e+00> : vector<8x128xf32>
    %111 = tpu.matmul %110, %3, %cst_53 {dimension_numbers = #tpu.dot_dimension_numbers<[1], [0], [0], [1], [0, 0, 1, 1], [], []>} : vector<8x128xbf16>, vector<128x128xbf16>, vector<8x128xf32> -> vector<8x128xf32>
    %112 = arith.addf %109, %111 : vector<8x128xf32>
    %113 = arith.negf %112 : vector<8x128xf32>
    %114 = math.exp %113 : vector<8x128xf32>
    %cst_54 = arith.constant 1.000000e+00 : f32
    %115 = vector.broadcast %cst_54 : f32 to vector<8x128xf32>
    %116 = arith.addf %115, %114 : vector<8x128xf32>
    %117 = arith.divf %115, %116 : vector<8x128xf32>
    %118 = math.tanh %112 : vector<8x128xf32>
    %c96_i32_55 = arith.constant 96 : i32
    %119 = tpu.dynamic_rotate %117 by %c96_i32_55 dim 1 : vector<8x128xf32>, i32 -> vector<8x128xf32>
    %c64_i32_56 = arith.constant 64 : i32
    %120 = tpu.dynamic_rotate %118 by %c64_i32_56 dim 1 : vector<8x128xf32>, i32 -> vector<8x128xf32>
    %c32_i32_57 = arith.constant 32 : i32
    %121 = tpu.dynamic_rotate %117 by %c32_i32_57 dim 1 : vector<8x128xf32>, i32 -> vector<8x128xf32>
    %122 = arith.mulf %119, %105 : vector<8x128xf32>
    %123 = arith.mulf %117, %120 : vector<8x128xf32>
    %124 = arith.addf %122, %123 : vector<8x128xf32>
    %125 = math.tanh %124 : vector<8x128xf32>
    %126 = arith.mulf %121, %125 : vector<8x128xf32>
    %c40_58 = arith.constant 40 : index
    %c0_59 = arith.constant 0 : index
    %127 = vector.load %arg8[%c40_58, %c0_59] : memref<64x128xf32, #tpu.memory_space<vmem>>, vector<8x128xf32>
    tpu.vector_store %arg8[%c40_58, %c0_59], %126 {strides = array<i32>} : memref<64x128xf32, #tpu.memory_space<vmem>>, vector<8x128xf32>,
    %c48 = arith.constant 48 : index
    %c0_60 = arith.constant 0 : index
    %128 = vector.load %arg7[%c48, %c0_60] : memref<64x128xf32, #tpu.memory_space<vmem>>, vector<8x128xf32>
    %129 = arith.truncf %126 : vector<8x128xf32> to vector<8x128xbf16>
    %cst_61 = arith.constant dense<0.000000e+00> : vector<8x128xf32>
    %130 = tpu.matmul %129, %3, %cst_61 {dimension_numbers = #tpu.dot_dimension_numbers<[1], [0], [0], [1], [0, 0, 1, 1], [], []>} : vector<8x128xbf16>, vector<128x128xbf16>, vector<8x128xf32> -> vector<8x128xf32>
    %131 = arith.addf %128, %130 : vector<8x128xf32>
    %132 = arith.negf %131 : vector<8x128xf32>
    %133 = math.exp %132 : vector<8x128xf32>
    %cst_62 = arith.constant 1.000000e+00 : f32
    %134 = vector.broadcast %cst_62 : f32 to vector<8x128xf32>
    %135 = arith.addf %134, %133 : vector<8x128xf32>
    %136 = arith.divf %134, %135 : vector<8x128xf32>
    %137 = math.tanh %131 : vector<8x128xf32>
    %c96_i32_63 = arith.constant 96 : i32
    %138 = tpu.dynamic_rotate %136 by %c96_i32_63 dim 1 : vector<8x128xf32>, i32 -> vector<8x128xf32>
    %c64_i32_64 = arith.constant 64 : i32
    %139 = tpu.dynamic_rotate %137 by %c64_i32_64 dim 1 : vector<8x128xf32>, i32 -> vector<8x128xf32>
    %c32_i32_65 = arith.constant 32 : i32
    %140 = tpu.dynamic_rotate %136 by %c32_i32_65 dim 1 : vector<8x128xf32>, i32 -> vector<8x128xf32>
    %141 = arith.mulf %138, %124 : vector<8x128xf32>
    %142 = arith.mulf %136, %139 : vector<8x128xf32>
    %143 = arith.addf %141, %142 : vector<8x128xf32>
    %144 = math.tanh %143 : vector<8x128xf32>
    %145 = arith.mulf %140, %144 : vector<8x128xf32>
    %c48_66 = arith.constant 48 : index
    %c0_67 = arith.constant 0 : index
    %146 = vector.load %arg8[%c48_66, %c0_67] : memref<64x128xf32, #tpu.memory_space<vmem>>, vector<8x128xf32>
    tpu.vector_store %arg8[%c48_66, %c0_67], %145 {strides = array<i32>} : memref<64x128xf32, #tpu.memory_space<vmem>>, vector<8x128xf32>,
    %c56 = arith.constant 56 : index
    %c0_68 = arith.constant 0 : index
    %147 = vector.load %arg7[%c56, %c0_68] : memref<64x128xf32, #tpu.memory_space<vmem>>, vector<8x128xf32>
    %148 = arith.truncf %145 : vector<8x128xf32> to vector<8x128xbf16>
    %cst_69 = arith.constant dense<0.000000e+00> : vector<8x128xf32>
    %149 = tpu.matmul %148, %3, %cst_69 {dimension_numbers = #tpu.dot_dimension_numbers<[1], [0], [0], [1], [0, 0, 1, 1], [], []>} : vector<8x128xbf16>, vector<128x128xbf16>, vector<8x128xf32> -> vector<8x128xf32>
    %150 = arith.addf %147, %149 : vector<8x128xf32>
    %151 = arith.negf %150 : vector<8x128xf32>
    %152 = math.exp %151 : vector<8x128xf32>
    %cst_70 = arith.constant 1.000000e+00 : f32
    %153 = vector.broadcast %cst_70 : f32 to vector<8x128xf32>
    %154 = arith.addf %153, %152 : vector<8x128xf32>
    %155 = arith.divf %153, %154 : vector<8x128xf32>
    %156 = math.tanh %150 : vector<8x128xf32>
    %c96_i32_71 = arith.constant 96 : i32
    %157 = tpu.dynamic_rotate %155 by %c96_i32_71 dim 1 : vector<8x128xf32>, i32 -> vector<8x128xf32>
    %c64_i32_72 = arith.constant 64 : i32
    %158 = tpu.dynamic_rotate %156 by %c64_i32_72 dim 1 : vector<8x128xf32>, i32 -> vector<8x128xf32>
    %c32_i32_73 = arith.constant 32 : i32
    %159 = tpu.dynamic_rotate %155 by %c32_i32_73 dim 1 : vector<8x128xf32>, i32 -> vector<8x128xf32>
    %160 = arith.mulf %157, %143 : vector<8x128xf32>
    %161 = arith.mulf %155, %158 : vector<8x128xf32>
    %162 = arith.addf %160, %161 : vector<8x128xf32>
    %163 = math.tanh %162 : vector<8x128xf32>
    %164 = arith.mulf %159, %163 : vector<8x128xf32>
    %c56_74 = arith.constant 56 : index
    %c0_75 = arith.constant 0 : index
    %165 = vector.load %arg8[%c56_74, %c0_75] : memref<64x128xf32, #tpu.memory_space<vmem>>, vector<8x128xf32>
    tpu.vector_store %arg8[%c56_74, %c0_75], %164 {strides = array<i32>} : memref<64x128xf32, #tpu.memory_space<vmem>>, vector<8x128xf32>,
    %c1 = arith.constant 1 : index
    %c0_76 = arith.constant 0 : index
    %c0_77 = arith.constant 0 : index
    %166 = vector.load %arg1[%c1, %c0_76, %c0_77] : memref<2x128x128xbf16, #tpu.memory_space<vmem>>, vector<1x128x128xbf16>
    %167 = vector.shape_cast %166 : vector<1x128x128xbf16> to vector<128x128xbf16>
    %c1_78 = arith.constant 1 : index
    %c0_79 = arith.constant 0 : index
    %c0_80 = arith.constant 0 : index
    %168 = vector.load %arg2[%c1_78, %c0_79, %c0_80] : memref<2x128x128xbf16, #tpu.memory_space<vmem>>, vector<1x128x128xbf16>
    %169 = vector.shape_cast %168 : vector<1x128x128xbf16> to vector<128x128xbf16>
    %c1_81 = arith.constant 1 : index
    %c0_82 = arith.constant 0 : index
    %c0_83 = arith.constant 0 : index
    %170 = vector.load %arg3[%c1_81, %c0_82, %c0_83] : memref<2x1x128xf32, #tpu.memory_space<vmem>>, vector<1x1x128xf32>
    %171 = vector.shape_cast %170 : vector<1x1x128xf32> to vector<1x128xf32>
    %c0_84 = arith.constant 0 : index
    %c0_85 = arith.constant 0 : index
    %172 = vector.load %arg8[%c0_84, %c0_85] : memref<64x128xf32, #tpu.memory_space<vmem>>, vector<64x128xf32>
    %173 = arith.truncf %172 : vector<64x128xf32> to vector<64x128xbf16>
    %cst_86 = arith.constant dense<0.000000e+00> : vector<64x128xf32>
    %174 = tpu.matmul %173, %167, %cst_86 {dimension_numbers = #tpu.dot_dimension_numbers<[1], [0], [0], [1], [0, 0, 1, 1], [], []>} : vector<64x128xbf16>, vector<128x128xbf16>, vector<64x128xf32> -> vector<64x128xf32>
    %175 = vector.broadcast %171 : vector<1x128xf32> to vector<64x128xf32>
    %176 = arith.addf %174, %175 : vector<64x128xf32>
    %c0_87 = arith.constant 0 : index
    %c0_88 = arith.constant 0 : index
    %177 = vector.load %arg7[%c0_87, %c0_88] : memref<64x128xf32, #tpu.memory_space<vmem>>, vector<64x128xf32>
    tpu.vector_store %arg7[%c0_87, %c0_88], %176 {strides = array<i32>} : memref<64x128xf32, #tpu.memory_space<vmem>>, vector<64x128xf32>,
    %cst_89 = arith.constant 0.000000e+00 : f32
    %178 = vector.broadcast %cst_89 : f32 to vector<8x128xf32>
    %cst_90 = arith.constant 0.000000e+00 : f32
    %179 = vector.broadcast %cst_90 : f32 to vector<8x128xf32>
    %c0_91 = arith.constant 0 : index
    %c0_92 = arith.constant 0 : index
    %180 = vector.load %arg7[%c0_91, %c0_92] : memref<64x128xf32, #tpu.memory_space<vmem>>, vector<8x128xf32>
    %181 = arith.truncf %178 : vector<8x128xf32> to vector<8x128xbf16>
    %cst_93 = arith.constant dense<0.000000e+00> : vector<8x128xf32>
    %182 = tpu.matmul %181, %169, %cst_93 {dimension_numbers = #tpu.dot_dimension_numbers<[1], [0], [0], [1], [0, 0, 1, 1], [], []>} : vector<8x128xbf16>, vector<128x128xbf16>, vector<8x128xf32> -> vector<8x128xf32>
    %183 = arith.addf %180, %182 : vector<8x128xf32>
    %184 = arith.negf %183 : vector<8x128xf32>
    %185 = math.exp %184 : vector<8x128xf32>
    %cst_94 = arith.constant 1.000000e+00 : f32
    %186 = vector.broadcast %cst_94 : f32 to vector<8x128xf32>
    %187 = arith.addf %186, %185 : vector<8x128xf32>
    %188 = arith.divf %186, %187 : vector<8x128xf32>
    %189 = math.tanh %183 : vector<8x128xf32>
    %c96_i32_95 = arith.constant 96 : i32
    %190 = tpu.dynamic_rotate %188 by %c96_i32_95 dim 1 : vector<8x128xf32>, i32 -> vector<8x128xf32>
    %c64_i32_96 = arith.constant 64 : i32
    %191 = tpu.dynamic_rotate %189 by %c64_i32_96 dim 1 : vector<8x128xf32>, i32 -> vector<8x128xf32>
    %c32_i32_97 = arith.constant 32 : i32
    %192 = tpu.dynamic_rotate %188 by %c32_i32_97 dim 1 : vector<8x128xf32>, i32 -> vector<8x128xf32>
    %193 = arith.mulf %190, %179 : vector<8x128xf32>
    %194 = arith.mulf %188, %191 : vector<8x128xf32>
    %195 = arith.addf %193, %194 : vector<8x128xf32>
    %196 = math.tanh %195 : vector<8x128xf32>
    %197 = arith.mulf %192, %196 : vector<8x128xf32>
    %c8_98 = arith.constant 8 : index
    %c0_99 = arith.constant 0 : index
    %198 = vector.load %arg7[%c8_98, %c0_99] : memref<64x128xf32, #tpu.memory_space<vmem>>, vector<8x128xf32>
    %199 = arith.truncf %197 : vector<8x128xf32> to vector<8x128xbf16>
    %cst_100 = arith.constant dense<0.000000e+00> : vector<8x128xf32>
    %200 = tpu.matmul %199, %169, %cst_100 {dimension_numbers = #tpu.dot_dimension_numbers<[1], [0], [0], [1], [0, 0, 1, 1], [], []>} : vector<8x128xbf16>, vector<128x128xbf16>, vector<8x128xf32> -> vector<8x128xf32>
    %201 = arith.addf %198, %200 : vector<8x128xf32>
    %202 = arith.negf %201 : vector<8x128xf32>
    %203 = math.exp %202 : vector<8x128xf32>
    %cst_101 = arith.constant 1.000000e+00 : f32
    %204 = vector.broadcast %cst_101 : f32 to vector<8x128xf32>
    %205 = arith.addf %204, %203 : vector<8x128xf32>
    %206 = arith.divf %204, %205 : vector<8x128xf32>
    %207 = math.tanh %201 : vector<8x128xf32>
    %c96_i32_102 = arith.constant 96 : i32
    %208 = tpu.dynamic_rotate %206 by %c96_i32_102 dim 1 : vector<8x128xf32>, i32 -> vector<8x128xf32>
    %c64_i32_103 = arith.constant 64 : i32
    %209 = tpu.dynamic_rotate %207 by %c64_i32_103 dim 1 : vector<8x128xf32>, i32 -> vector<8x128xf32>
    %c32_i32_104 = arith.constant 32 : i32
    %210 = tpu.dynamic_rotate %206 by %c32_i32_104 dim 1 : vector<8x128xf32>, i32 -> vector<8x128xf32>
    %211 = arith.mulf %208, %195 : vector<8x128xf32>
    %212 = arith.mulf %206, %209 : vector<8x128xf32>
    %213 = arith.addf %211, %212 : vector<8x128xf32>
    %214 = math.tanh %213 : vector<8x128xf32>
    %215 = arith.mulf %210, %214 : vector<8x128xf32>
    %c16_105 = arith.constant 16 : index
    %c0_106 = arith.constant 0 : index
    %216 = vector.load %arg7[%c16_105, %c0_106] : memref<64x128xf32, #tpu.memory_space<vmem>>, vector<8x128xf32>
    %217 = arith.truncf %215 : vector<8x128xf32> to vector<8x128xbf16>
    %cst_107 = arith.constant dense<0.000000e+00> : vector<8x128xf32>
    %218 = tpu.matmul %217, %169, %cst_107 {dimension_numbers = #tpu.dot_dimension_numbers<[1], [0], [0], [1], [0, 0, 1, 1], [], []>} : vector<8x128xbf16>, vector<128x128xbf16>, vector<8x128xf32> -> vector<8x128xf32>
    %219 = arith.addf %216, %218 : vector<8x128xf32>
    %220 = arith.negf %219 : vector<8x128xf32>
    %221 = math.exp %220 : vector<8x128xf32>
    %cst_108 = arith.constant 1.000000e+00 : f32
    %222 = vector.broadcast %cst_108 : f32 to vector<8x128xf32>
    %223 = arith.addf %222, %221 : vector<8x128xf32>
    %224 = arith.divf %222, %223 : vector<8x128xf32>
    %225 = math.tanh %219 : vector<8x128xf32>
    %c96_i32_109 = arith.constant 96 : i32
    %226 = tpu.dynamic_rotate %224 by %c96_i32_109 dim 1 : vector<8x128xf32>, i32 -> vector<8x128xf32>
    %c64_i32_110 = arith.constant 64 : i32
    %227 = tpu.dynamic_rotate %225 by %c64_i32_110 dim 1 : vector<8x128xf32>, i32 -> vector<8x128xf32>
    %c32_i32_111 = arith.constant 32 : i32
    %228 = tpu.dynamic_rotate %224 by %c32_i32_111 dim 1 : vector<8x128xf32>, i32 -> vector<8x128xf32>
    %229 = arith.mulf %226, %213 : vector<8x128xf32>
    %230 = arith.mulf %224, %227 : vector<8x128xf32>
    %231 = arith.addf %229, %230 : vector<8x128xf32>
    %232 = math.tanh %231 : vector<8x128xf32>
    %233 = arith.mulf %228, %232 : vector<8x128xf32>
    %c24_112 = arith.constant 24 : index
    %c0_113 = arith.constant 0 : index
    %234 = vector.load %arg7[%c24_112, %c0_113] : memref<64x128xf32, #tpu.memory_space<vmem>>, vector<8x128xf32>
    %235 = arith.truncf %233 : vector<8x128xf32> to vector<8x128xbf16>
    %cst_114 = arith.constant dense<0.000000e+00> : vector<8x128xf32>
    %236 = tpu.matmul %235, %169, %cst_114 {dimension_numbers = #tpu.dot_dimension_numbers<[1], [0], [0], [1], [0, 0, 1, 1], [], []>} : vector<8x128xbf16>, vector<128x128xbf16>, vector<8x128xf32> -> vector<8x128xf32>
    %237 = arith.addf %234, %236 : vector<8x128xf32>
    %238 = arith.negf %237 : vector<8x128xf32>
    %239 = math.exp %238 : vector<8x128xf32>
    %cst_115 = arith.constant 1.000000e+00 : f32
    %240 = vector.broadcast %cst_115 : f32 to vector<8x128xf32>
    %241 = arith.addf %240, %239 : vector<8x128xf32>
    %242 = arith.divf %240, %241 : vector<8x128xf32>
    %243 = math.tanh %237 : vector<8x128xf32>
    %c96_i32_116 = arith.constant 96 : i32
    %244 = tpu.dynamic_rotate %242 by %c96_i32_116 dim 1 : vector<8x128xf32>, i32 -> vector<8x128xf32>
    %c64_i32_117 = arith.constant 64 : i32
    %245 = tpu.dynamic_rotate %243 by %c64_i32_117 dim 1 : vector<8x128xf32>, i32 -> vector<8x128xf32>
    %c32_i32_118 = arith.constant 32 : i32
    %246 = tpu.dynamic_rotate %242 by %c32_i32_118 dim 1 : vector<8x128xf32>, i32 -> vector<8x128xf32>
    %247 = arith.mulf %244, %231 : vector<8x128xf32>
    %248 = arith.mulf %242, %245 : vector<8x128xf32>
    %249 = arith.addf %247, %248 : vector<8x128xf32>
    %250 = math.tanh %249 : vector<8x128xf32>
    %251 = arith.mulf %246, %250 : vector<8x128xf32>
    %c32_119 = arith.constant 32 : index
    %c0_120 = arith.constant 0 : index
    %252 = vector.load %arg7[%c32_119, %c0_120] : memref<64x128xf32, #tpu.memory_space<vmem>>, vector<8x128xf32>
    %253 = arith.truncf %251 : vector<8x128xf32> to vector<8x128xbf16>
    %cst_121 = arith.constant dense<0.000000e+00> : vector<8x128xf32>
    %254 = tpu.matmul %253, %169, %cst_121 {dimension_numbers = #tpu.dot_dimension_numbers<[1], [0], [0], [1], [0, 0, 1, 1], [], []>} : vector<8x128xbf16>, vector<128x128xbf16>, vector<8x128xf32> -> vector<8x128xf32>
    %255 = arith.addf %252, %254 : vector<8x128xf32>
    %256 = arith.negf %255 : vector<8x128xf32>
    %257 = math.exp %256 : vector<8x128xf32>
    %cst_122 = arith.constant 1.000000e+00 : f32
    %258 = vector.broadcast %cst_122 : f32 to vector<8x128xf32>
    %259 = arith.addf %258, %257 : vector<8x128xf32>
    %260 = arith.divf %258, %259 : vector<8x128xf32>
    %261 = math.tanh %255 : vector<8x128xf32>
    %c96_i32_123 = arith.constant 96 : i32
    %262 = tpu.dynamic_rotate %260 by %c96_i32_123 dim 1 : vector<8x128xf32>, i32 -> vector<8x128xf32>
    %c64_i32_124 = arith.constant 64 : i32
    %263 = tpu.dynamic_rotate %261 by %c64_i32_124 dim 1 : vector<8x128xf32>, i32 -> vector<8x128xf32>
    %c32_i32_125 = arith.constant 32 : i32
    %264 = tpu.dynamic_rotate %260 by %c32_i32_125 dim 1 : vector<8x128xf32>, i32 -> vector<8x128xf32>
    %265 = arith.mulf %262, %249 : vector<8x128xf32>
    %266 = arith.mulf %260, %263 : vector<8x128xf32>
    %267 = arith.addf %265, %266 : vector<8x128xf32>
    %268 = math.tanh %267 : vector<8x128xf32>
    %269 = arith.mulf %264, %268 : vector<8x128xf32>
    %c40_126 = arith.constant 40 : index
    %c0_127 = arith.constant 0 : index
    %270 = vector.load %arg7[%c40_126, %c0_127] : memref<64x128xf32, #tpu.memory_space<vmem>>, vector<8x128xf32>
    %271 = arith.truncf %269 : vector<8x128xf32> to vector<8x128xbf16>
    %cst_128 = arith.constant dense<0.000000e+00> : vector<8x128xf32>
    %272 = tpu.matmul %271, %169, %cst_128 {dimension_numbers = #tpu.dot_dimension_numbers<[1], [0], [0], [1], [0, 0, 1, 1], [], []>} : vector<8x128xbf16>, vector<128x128xbf16>, vector<8x128xf32> -> vector<8x128xf32>
    %273 = arith.addf %270, %272 : vector<8x128xf32>
    %274 = arith.negf %273 : vector<8x128xf32>
    %275 = math.exp %274 : vector<8x128xf32>
    %cst_129 = arith.constant 1.000000e+00 : f32
    %276 = vector.broadcast %cst_129 : f32 to vector<8x128xf32>
    %277 = arith.addf %276, %275 : vector<8x128xf32>
    %278 = arith.divf %276, %277 : vector<8x128xf32>
    %279 = math.tanh %273 : vector<8x128xf32>
    %c96_i32_130 = arith.constant 96 : i32
    %280 = tpu.dynamic_rotate %278 by %c96_i32_130 dim 1 : vector<8x128xf32>, i32 -> vector<8x128xf32>
    %c64_i32_131 = arith.constant 64 : i32
    %281 = tpu.dynamic_rotate %279 by %c64_i32_131 dim 1 : vector<8x128xf32>, i32 -> vector<8x128xf32>
    %c32_i32_132 = arith.constant 32 : i32
    %282 = tpu.dynamic_rotate %278 by %c32_i32_132 dim 1 : vector<8x128xf32>, i32 -> vector<8x128xf32>
    %283 = arith.mulf %280, %267 : vector<8x128xf32>
    %284 = arith.mulf %278, %281 : vector<8x128xf32>
    %285 = arith.addf %283, %284 : vector<8x128xf32>
    %286 = math.tanh %285 : vector<8x128xf32>
    %287 = arith.mulf %282, %286 : vector<8x128xf32>
    %c48_133 = arith.constant 48 : index
    %c0_134 = arith.constant 0 : index
    %288 = vector.load %arg7[%c48_133, %c0_134] : memref<64x128xf32, #tpu.memory_space<vmem>>, vector<8x128xf32>
    %289 = arith.truncf %287 : vector<8x128xf32> to vector<8x128xbf16>
    %cst_135 = arith.constant dense<0.000000e+00> : vector<8x128xf32>
    %290 = tpu.matmul %289, %169, %cst_135 {dimension_numbers = #tpu.dot_dimension_numbers<[1], [0], [0], [1], [0, 0, 1, 1], [], []>} : vector<8x128xbf16>, vector<128x128xbf16>, vector<8x128xf32> -> vector<8x128xf32>
    %291 = arith.addf %288, %290 : vector<8x128xf32>
    %292 = arith.negf %291 : vector<8x128xf32>
    %293 = math.exp %292 : vector<8x128xf32>
    %cst_136 = arith.constant 1.000000e+00 : f32
    %294 = vector.broadcast %cst_136 : f32 to vector<8x128xf32>
    %295 = arith.addf %294, %293 : vector<8x128xf32>
    %296 = arith.divf %294, %295 : vector<8x128xf32>
    %297 = math.tanh %291 : vector<8x128xf32>
    %c96_i32_137 = arith.constant 96 : i32
    %298 = tpu.dynamic_rotate %296 by %c96_i32_137 dim 1 : vector<8x128xf32>, i32 -> vector<8x128xf32>
    %c64_i32_138 = arith.constant 64 : i32
    %299 = tpu.dynamic_rotate %297 by %c64_i32_138 dim 1 : vector<8x128xf32>, i32 -> vector<8x128xf32>
    %c32_i32_139 = arith.constant 32 : i32
    %300 = tpu.dynamic_rotate %296 by %c32_i32_139 dim 1 : vector<8x128xf32>, i32 -> vector<8x128xf32>
    %301 = arith.mulf %298, %285 : vector<8x128xf32>
    %302 = arith.mulf %296, %299 : vector<8x128xf32>
    %303 = arith.addf %301, %302 : vector<8x128xf32>
    %304 = math.tanh %303 : vector<8x128xf32>
    %305 = arith.mulf %300, %304 : vector<8x128xf32>
    %c56_140 = arith.constant 56 : index
    %c0_141 = arith.constant 0 : index
    %306 = vector.load %arg7[%c56_140, %c0_141] : memref<64x128xf32, #tpu.memory_space<vmem>>, vector<8x128xf32>
    %307 = arith.truncf %305 : vector<8x128xf32> to vector<8x128xbf16>
    %cst_142 = arith.constant dense<0.000000e+00> : vector<8x128xf32>
    %308 = tpu.matmul %307, %169, %cst_142 {dimension_numbers = #tpu.dot_dimension_numbers<[1], [0], [0], [1], [0, 0, 1, 1], [], []>} : vector<8x128xbf16>, vector<128x128xbf16>, vector<8x128xf32> -> vector<8x128xf32>
    %309 = arith.addf %306, %308 : vector<8x128xf32>
    %310 = arith.negf %309 : vector<8x128xf32>
    %311 = math.exp %310 : vector<8x128xf32>
    %cst_143 = arith.constant 1.000000e+00 : f32
    %312 = vector.broadcast %cst_143 : f32 to vector<8x128xf32>
    %313 = arith.addf %312, %311 : vector<8x128xf32>
    %314 = arith.divf %312, %313 : vector<8x128xf32>
    %315 = math.tanh %309 : vector<8x128xf32>
    %c96_i32_144 = arith.constant 96 : i32
    %316 = tpu.dynamic_rotate %314 by %c96_i32_144 dim 1 : vector<8x128xf32>, i32 -> vector<8x128xf32>
    %c64_i32_145 = arith.constant 64 : i32
    %317 = tpu.dynamic_rotate %315 by %c64_i32_145 dim 1 : vector<8x128xf32>, i32 -> vector<8x128xf32>
    %c32_i32_146 = arith.constant 32 : i32
    %318 = tpu.dynamic_rotate %314 by %c32_i32_146 dim 1 : vector<8x128xf32>, i32 -> vector<8x128xf32>
    %319 = arith.mulf %316, %303 : vector<8x128xf32>
    %320 = arith.mulf %314, %317 : vector<8x128xf32>
    %321 = arith.addf %319, %320 : vector<8x128xf32>
    %322 = math.tanh %321 : vector<8x128xf32>
    %323 = arith.mulf %318, %322 : vector<8x128xf32>
    %324 = arith.truncf %323 : vector<8x128xf32> to vector<8x128xbf16>
    %c0_147 = arith.constant 0 : index
    %c0_148 = arith.constant 0 : index
    %325 = vector.load %arg4[%c0_147, %c0_148] : memref<128x128xbf16, #tpu.memory_space<vmem>>, vector<128x128xbf16>
    %cst_149 = arith.constant dense<0.000000e+00> : vector<8x128xf32>
    %326 = tpu.matmul %324, %325, %cst_149 {dimension_numbers = #tpu.dot_dimension_numbers<[1], [0], [0], [1], [0, 0, 1, 1], [], []>} : vector<8x128xbf16>, vector<128x128xbf16>, vector<8x128xf32> -> vector<8x128xf32>
    %c0_150 = arith.constant 0 : index
    %c0_151 = arith.constant 0 : index
    %327 = vector.load %arg5[%c0_150, %c0_151] : memref<1x128xf32, #tpu.memory_space<vmem>>, vector<1x128xf32>
    %328 = vector.broadcast %327 : vector<1x128xf32> to vector<8x128xf32>
    %329 = arith.addf %326, %328 : vector<8x128xf32>
    %c0_152 = arith.constant 0 : index
    %c0_153 = arith.constant 0 : index
    %330 = vector.load %arg6[%c0_152, %c0_153] : memref<8x128xf32, #tpu.memory_space<vmem>>, vector<8x128xf32>
    tpu.vector_store %arg6[%c0_152, %c0_153], %329 {strides = array<i32>} : memref<8x128xf32, #tpu.memory_space<vmem>>, vector<8x128xf32>,
    return
  }
}

</mosaic_0001>

<bundles_post_ra>
// kernel: lstm_model_forward.1
= control target key start
LH: loop header
LB: loop body
LE: loop exit
PB: predicated region body
PF: predicated region fallthrough
CT: control target
= control target key end

     0   :  { %11 = vsyncpa [#allocation5], 0  ;;  %s3058_s0 = inlined_call_operand.vmem [shape: f32[64,128], index: 0, kind: input, shape index: {}]   ;;  %s3059_s1 = inlined_call_operand.hbm [shape: bf16[2,128,128], index: 1, kind: input, shape index: {}]   ;;  %s3060_s2 = inlined_call_operand.hbm [shape: bf16[2,128,128], index: 2, kind: input, shape index: {}]   ;;  %s3061_s3 = inlined_call_operand.vmem [shape: f32[2,1,128], index: 3, kind: input, shape index: {}]   ;;  %s3062_s4 = inlined_call_operand.vmem [shape: bf16[128,128], index: 4, kind: input, shape index: {}]   ;;  %s3063_s5 = inlined_call_operand.vmem [shape: f32[1,128], index: 5, kind: input, shape index: {}]   ;;  %s3064_s6 = inlined_call_operand.vmem [shape: f32[8,128], index: 6, kind: output, shape index: {}]  }
   0x1   :  { %12 = vsyncpa [#allocation7], 0  ;;  %s2446_s21 = smov [#allocation4]   ;;  %s2398_s25 = scalar_lea.hbm %s3059_s1, 2048 }
   0x2   :  { %s20_s22 = sshll.u32 %s2446_s21, 4  ;;  %p2399_p0 = scmp.ne.s32.totalorder %s3059_s1, %s2398_s25  ;;  %s21_s22 = int_to_ptr.vmem [resolvable:$true] %s20_s22 }
   0x3   :  { %p2402_p1 = scmp.lt.u32.totalorder %s2398_s25, %s3059_s1 }
   0x5   :  { %p2404_p2 = pnand %p2402_p1, %p2399_p0 }
   0x7   :  { %2407 = shalt.err (!%p2404_p2)
}
   0x8   :  { %s2408_s30 = scalar_lea.vmem %s21_s22, 2048  ;;  %p2413_p4 = scmp.lt.s32.totalorder %s21_s22, %s21_s22 }
   0x9   :  { %p2409_p3 = scmp.ne.s32.totalorder %s21_s22, %s2408_s30  ;;  %p2414_p5 = scmp.lt.s32.totalorder %s2408_s30, %s2408_s30 }
   0xb   :  { %p2415_p6 = por %p2414_p5, %p2413_p4 }
   0xd   :  { %p2416_p7 = pnand %p2415_p6, %p2409_p3 }
   0xf   :  { %2419 = shalt.err (!%p2416_p7)
}
  0x10   :  { %s2447_s7 = smov 64   ;;  %s2448_s8 = smov 4  }
  0x11   :  { %26 = dma.hbm_to_vmem [thread:$0]  %s3059_s1, 2048, %s21_s22, [#allocation5], %s2447_s7, %s2447_s7, %s2448_s8  }
  0x12   :  { %s2449_s11 = smov [#allocation6]   ;;  %s2420_s15 = scalar_lea.hbm %s3060_s2, 2048 }
  0x13   :  { %s32_s12 = sshll.u32 %s2449_s11, 4  ;;  %p2421_p8 = scmp.ne.s32.totalorder %s3060_s2, %s2420_s15  ;;  %s33_s12 = int_to_ptr.vmem [resolvable:$true] %s32_s12 }
  0x14   :  { %p2424_p9 = scmp.lt.u32.totalorder %s2420_s15, %s3060_s2 }
  0x16   :  { %p2426_p10 = pnand %p2424_p9, %p2421_p8 }
  0x18   :  { %2429 = shalt.err (!%p2426_p10)
}
  0x19   :  { %s2430_s20 = scalar_lea.vmem %s33_s12, 2048  ;;  %p2435_p12 = scmp.lt.s32.totalorder %s33_s12, %s33_s12 }
  0x1a   :  { %p2431_p11 = scmp.ne.s32.totalorder %s33_s12, %s2430_s20  ;;  %p2436_p13 = scmp.lt.s32.totalorder %s2430_s20, %s2430_s20 }
  0x1c   :  { %p2437_p0 = por %p2436_p13, %p2435_p12 }
  0x1e   :  { %p2438_p1 = pnand %p2437_p0, %p2431_p11 }
  0x20   :  { %2441 = shalt.err (!%p2438_p1)
}
  0x21   :  { %38 = dma.hbm_to_vmem [thread:$0]  %s3060_s2, 2048, %s33_s12, [#allocation7], %s2447_s7, %s2447_s7, %s2448_s8  }
  0x22   :  { %2442 = dma.done.wait [#allocation5], 2048  }
  0x23   :  { %2443 = vsyncadd [#allocation5], 4294965248 }
  0x24   :  { %2444 = dma.done.wait [#allocation7], 2048  }
  0x25   :  { %2445 = vsyncadd [#allocation7], 4294965248  ;;  %v2450_v0 = vmov 0.0   ;;  %vm2451_vm0 = vmmov 0   ;;  %v2230_v1 = vld [vmem:[#allocation4] sm:$0xff]   ;;  %v2232_v3 = vld [vmem:[#allocation4 + $0x8] sm:$0xff]  }
  0x26   :  { %1857 = vmatprep.subr.bf16.mxu1 %v2450_v0  ;;  %1873 = vmatprep.mubr.msk.bf16.mxu1 %vm2451_vm0, %v2450_v0  ;;  %v2521_v2 = vld [vmem:[#allocation6] sm:$0xff]   ;;  %v2524_v4 = vld [vmem:[#allocation6 + $0x8] sm:$0xff]   ;;  %v2234_v5 = vld [vmem:[#allocation4 + $0x10] sm:$0xff]   ;;  %v2452_v23 = vmov 0   ;;  %s2453_s16 = smov 32   ;;  %s2454_s17 = smov 96  }
  0x27   :  { %1833 = vmatprep.subr.bf16.mxu0 %v2230_v1  ;;  %1858 = vmatpush3.bf16.msra.mxu1 %v2521_v2  ;;  %v2528_v6 = vld [vmem:[#allocation6 + $0x10] sm:$0xff]   ;;  %v2236_v7 = vld [vmem:[#allocation4 + $0x18] sm:$0xff]   ;;  %v2238_v9 = vld [vmem:[#allocation4 + $0x20] sm:$0xff]  }
  0x28   :  { %1834 = vmatpush3.bf16.msra.mxu0 %v2230_v1  ;;  %1859 = vmatprep.subr.bf16.mxu1 %v2450_v0  ;;  %v2532_v8 = vld [vmem:[#allocation6 + $0x18] sm:$0xff]   ;;  %v2536_v10 = vld [vmem:[#allocation6 + $0x20] sm:$0xff]   ;;  %v2240_v11 = vld [vmem:[#allocation4 + $0x28] sm:$0xff]  }
  0x29   :  { %1835 = vmatprep.subr.bf16.mxu0 %v2232_v3  ;;  %v85_v12 = vld [vmem:[%s3058_s0] sm:$0xff]  ;;  %v86_v13 = vld [vmem:[%s3058_s0 + $0x8] sm:$0xff]  ;;  %v2242_v16 = vld [vmem:[#allocation4 + $0x30] sm:$0xff]  }
  0x2a   :  { %v2545_v14 = vld [vmem:[#allocation6 + $0x28] sm:$0xff]   ;;  %v93_v15 = vpack.c.bf16 %v86_v13, %v85_v12  ;;  %v2549_v17 = vld [vmem:[#allocation6 + $0x30] sm:$0xff]   ;;  %v2244_v18 = vld [vmem:[#allocation4 + $0x38] sm:$0xff]  }
  0x2b   :  { %1860 = vmatpush3.bf16.msra.mxu1 %v2524_v4  ;;  %v2553_v19 = vld [vmem:[#allocation6 + $0x38] sm:$0xff]   ;;  %v87_v20 = vld [vmem:[%s3058_s0 + $0x10] sm:$0xff]  ;;  %v2604_v24 = vld [vmem:[%s3061_s3] ss:$0 sm:$0xff] }
  0x2c   :  { %1836 = vmatpush3.bf16.msra.mxu0 %v2232_v3  ;;  %1861 = vmatprep.subr.bf16.mxu1 %v2450_v0  ;;  %v88_v21 = vld [vmem:[%s3058_s0 + $0x18] sm:$0xff]  ;;  %v89_v38 = vld [vmem:[%s3058_s0 + $0x20] sm:$0xff]  ;;  %v90_v39 = vld [vmem:[%s3058_s0 + $0x28] sm:$0xff] }
  0x2d   :  { %1837 = vmatprep.subr.bf16.mxu0 %v2234_v5  ;;  %1849 = vmatprep.mubr.bf16.mxu0 %v93_v15  ;;  %v94_v22 = vpack.c.bf16 %v88_v21, %v87_v20  ;;  %v91_v40 = vld [vmem:[%s3058_s0 + $0x30] sm:$0xff]  ;;  %v95_v41 = vpack.c.bf16 %v90_v39, %v89_v38  ;;  %v92_v42 = vld [vmem:[%s3058_s0 + $0x38] sm:$0xff] }
  0x2e   :  { %v96_v43 = vpack.c.bf16 %v92_v42, %v91_v40 }
  0x2f   :  { %1862 = vmatpush3.bf16.msra.mxu1 %v2528_v6 }
  0x30   :  { %1838 = vmatpush3.bf16.msra.mxu0 %v2234_v5  ;;  %1863 = vmatprep.subr.bf16.mxu1 %v2450_v0 }
  0x31   :  { %1839 = vmatprep.subr.bf16.mxu0 %v2236_v7 }
  0x33   :  { %1864 = vmatpush3.bf16.msra.mxu1 %v2532_v8 }
  0x34   :  { %1840 = vmatpush3.bf16.msra.mxu0 %v2236_v7  ;;  %1865 = vmatprep.subr.bf16.mxu1 %v2450_v0 }
  0x35   :  { %1841 = vmatprep.subr.bf16.mxu0 %v2238_v9 }
  0x37   :  { %1866 = vmatpush3.bf16.msra.mxu1 %v2536_v10 }
  0x38   :  { %1842 = vmatpush3.bf16.msra.mxu0 %v2238_v9  ;;  %1867 = vmatprep.subr.bf16.mxu1 %v2450_v0 }
  0x39   :  { %1843 = vmatprep.subr.bf16.mxu0 %v2240_v11 }
  0x3b   :  { %1868 = vmatpush3.bf16.msra.mxu1 %v2545_v14 }
  0x3c   :  { %1844 = vmatpush3.bf16.msra.mxu0 %v2240_v11  ;;  %1869 = vmatprep.subr.bf16.mxu1 %v2450_v0 }
  0x3d   :  { %1845 = vmatprep.subr.bf16.mxu0 %v2242_v16 }
  0x3f   :  { %1870 = vmatpush3.bf16.msra.mxu1 %v2549_v17 }
  0x40   :  { %1846 = vmatpush3.bf16.msra.mxu0 %v2242_v16  ;;  %1871 = vmatprep.subr.bf16.mxu1 %v2450_v0 }
  0x41   :  { %1847 = vmatprep.subr.bf16.mxu0 %v2244_v18 }
  0x43   :  { %1872 = vmatpush3.bf16.msra.mxu1 %v2553_v19 }
  0x44   :  { %1848 = vmatpush3.bf16.msra.mxu0 %v2244_v18  ;;  %1897 = vmatprep.subr.bf16.mxu1 %v2450_v0 }
  0x45   :  { %1877 = vmatprep.subr.bf16.mxu0 %v2450_v0 }
  0x46   :  { %1874 = vmatmul.mubr.bf16.vlgmr.msra.gmra.mrb[0].mxu1 %v2452_v23 }
  0x47   :  { %1850 = vmatmul.mubr.bf16.vlgmr.msra.gmra.mrb[0].mxu0 %v94_v22  ;;  %1898 = vmatpush3.bf16.msra.mxu1 %v2521_v2 }
  0x48   :  { %1878 = vmatpush3.bf16.msra.mxu0 %v2521_v2  ;;  %1899 = vmatprep.subr.bf16.mxu1 %v2450_v0 }
  0x49   :  { %1879 = vmatprep.subr.bf16.mxu0 %v2450_v0  ;;  %1913 = vmatprep.mubr.msk.bf16.mxu1 %vm2451_vm0, %v2450_v0 }
  0x4a   :  { %1853 = vmatprep.mubr.bf16.mxu0 %v95_v41 }
  0x4b   :  { %1900 = vmatpush3.bf16.msra.mxu1 %v2524_v4 }
  0x4c   :  { %1880 = vmatpush3.bf16.msra.mxu0 %v2524_v4  ;;  %1901 = vmatprep.subr.bf16.mxu1 %v2450_v0 }
  0x4d   :  { %1881 = vmatprep.subr.bf16.mxu0 %v2450_v0 }
  0x4f   :  { %1902 = vmatpush3.bf16.msra.mxu1 %v2528_v6  ;;  %1854 = vmatmul.mubr.bf16.gmra.mrb[4].mxu0 %v96_v43 }
  0x50   :  { %1882 = vmatpush3.bf16.msra.mxu0 %v2528_v6  ;;  %1903 = vmatprep.subr.bf16.mxu1 %v2450_v0 }
  0x51   :  { %1883 = vmatprep.subr.bf16.mxu0 %v2450_v0  ;;  %1893 = vmatprep.mubr.msk.bf16.mxu0 %vm2451_vm0, %v2450_v0 }
  0x53   :  { %1904 = vmatpush3.bf16.msra.mxu1 %v2532_v8 }
  0x54   :  { %1884 = vmatpush3.bf16.msra.mxu0 %v2532_v8  ;;  %1905 = vmatprep.subr.bf16.mxu1 %v2450_v0 }
  0x55   :  { %1885 = vmatprep.subr.bf16.mxu0 %v2450_v0 }
  0x57   :  { %1906 = vmatpush3.bf16.msra.mxu1 %v2536_v10 }
  0x58   :  { %1886 = vmatpush3.bf16.msra.mxu0 %v2536_v10  ;;  %1907 = vmatprep.subr.bf16.mxu1 %v2450_v0 }
  0x59   :  { %1887 = vmatprep.subr.bf16.mxu0 %v2450_v0 }
  0x5b   :  { %1908 = vmatpush3.bf16.msra.mxu1 %v2545_v14 }
  0x5c   :  { %1888 = vmatpush3.bf16.msra.mxu0 %v2545_v14  ;;  %1909 = vmatprep.subr.bf16.mxu1 %v2450_v0 }
  0x5d   :  { %1889 = vmatprep.subr.bf16.mxu0 %v2450_v0 }
  0x5f   :  { %1910 = vmatpush3.bf16.msra.mxu1 %v2549_v17 }
  0x60   :  { %1890 = vmatpush3.bf16.msra.mxu0 %v2549_v17  ;;  %1911 = vmatprep.subr.bf16.mxu1 %v2450_v0 }
  0x61   :  { %1891 = vmatprep.subr.bf16.mxu0 %v2450_v0 }
  0x63   :  { %1912 = vmatpush3.bf16.msra.mxu1 %v2553_v19 }
  0x64   :  { %1892 = vmatpush3.bf16.msra.mxu0 %v2553_v19  ;;  %1937 = vmatprep.subr.bf16.mxu1 %v2450_v0 }
  0x65   :  { %1917 = vmatprep.subr.bf16.mxu0 %v2450_v0 }
 0x119   :  { %v307_v26 = vpop.f32.mrb[0].mxu1 }
 0x11a   :  { %v2606_v25 = vpop.f32.mrb[0].mxu0  ;;  %v1875_v28 = vpop.f32.mrb[1].mxu1 }
 0x11b   :  { %v185_v27 = vpop.f32.mrb[1].mxu0  ;;  %v310_v31 = vpop.f32.mrb[2].mxu1 }
 0x11c   :  { %v186_v29 = vadd.f32 %v2604_v24, %v185_v27  ;;  %v2609_v30 = vpop.f32.mrb[2].mxu0  ;;  %v1876_v33 = vpop.f32.mrb[3].mxu1  ;;  %v194_v27 = vadd.f32 %v2606_v25, %v2604_v24 }
 0x11d   :  { %v188_v32 = vpop.f32.mrb[3].mxu0 }
 0x11e   :  { %v313_v34 = vadd.f32 %v307_v26, %v186_v29  ;;  %v189_v59 = vadd.f32 %v2604_v24, %v188_v32 }
 0x120   :  { %v1613_v35 = vmul.f32 -1.442695, %v313_v34 }
 0x122   :  { %2270 = vpow2.f32 %v1613_v35  ;;  %v2650_v55 = vpop.f32.mrb[4].mxu0 }
 0x123   :  { %v2652_v56 = vpop.f32.mrb[5].mxu0 }
 0x124   :  { %v2654_v57 = vpop.f32.mrb[6].mxu0 }
 0x125   :  { %v2656_v58 = vpop.f32.mrb[7].mxu0 }
 0x12c   :  { %v2271_v36 = vpop.eup %2270 }
 0x12d   :  { %v317_v37 = vadd.f32 1.0, %v2271_v36 }
 0x12f   :  { %2272 = vrcp.f32 %v317_v37 }
 0x130   :  { %2274 = vtanh.f32 %v313_v34 }
 0x139   :  { %v2273_v44 = vpop.eup %2272 }
 0x13a   :  { %325 = vrot.lane.b32.xlu1 %v2273_v44, %s2453_s16  ;;  %321 = vrot.lane.b32.xlu0 %v2273_v44, %s2454_s17  ;;  %v2275_v45 = vpop.eup %2274 }
 0x13e   :  { %323 = vrot.lane.b32.xlu0 %v2275_v45, %s2447_s7 }
 0x1ac   :  { %v322_v46 = vpop.permute.xlu0 %321  ;;  %v326_v52 = vpop.permute.xlu1 %325 }
 0x1ad   :  { %v327_v48 = vmul.f32 0.0, %v322_v46 }
 0x1b0   :  { %v324_v47 = vpop.permute.xlu0 %323 }
 0x1b1   :  { %v328_v49 = vmul.f32 %v2273_v44, %v324_v47  ;;  %v197_v47 = vadd.f32 %v2609_v30, %v2604_v24 }
 0x1b3   :  { %v329_v50 = vadd.f32 %v328_v49, %v327_v48 }
 0x1b5   :  { %2276 = vtanh.f32 %v329_v50 }
 0x1bf   :  { %v2277_v51 = vpop.eup %2276 }
 0x1c0   :  { %v2628_v53 = vmul.f32 %v2277_v51, %v326_v52 }
 0x1c2   :  { %v334_v54 = vpack.c.bf16 %v2628_v53, %v2628_v53 }
 0x1c4   :  { %1894 = vmatmul.mubr.bf16.vlgmr.msra.gmra.mrb[8].mxu0 %v334_v54 }
 0x1c5   :  { %1918 = vmatpush3.bf16.msra.mxu0 %v2521_v2  ;;  %1933 = vmatprep.mubr.msk.bf16.mxu0 %vm2451_vm0, %v2450_v0 }
 0x1c6   :  { %1919 = vmatprep.subr.bf16.mxu0 %v2450_v0 }
 0x1c9   :  { %1920 = vmatpush3.bf16.msra.mxu0 %v2524_v4 }
 0x1ca   :  { %1921 = vmatprep.subr.bf16.mxu0 %v2450_v0 }
 0x1cd   :  { %1922 = vmatpush3.bf16.msra.mxu0 %v2528_v6 }
 0x1ce   :  { %1923 = vmatprep.subr.bf16.mxu0 %v2450_v0 }
 0x1d1   :  { %1924 = vmatpush3.bf16.msra.mxu0 %v2532_v8 }
 0x1d2   :  { %1925 = vmatprep.subr.bf16.mxu0 %v2450_v0 }
 0x1d5   :  { %1926 = vmatpush3.bf16.msra.mxu0 %v2536_v10 }
 0x1d6   :  { %1927 = vmatprep.subr.bf16.mxu0 %v2450_v0 }
 0x1d9   :  { %1928 = vmatpush3.bf16.msra.mxu0 %v2545_v14 }
 0x1da   :  { %1929 = vmatprep.subr.bf16.mxu0 %v2450_v0 }
 0x1dd   :  { %1930 = vmatpush3.bf16.msra.mxu0 %v2549_v17 }
 0x1de   :  { %1931 = vmatprep.subr.bf16.mxu0 %v2450_v0 }
 0x1e1   :  { %1932 = vmatpush3.bf16.msra.mxu0 %v2553_v19 }
 0x1e2   :  { %1957 = vmatprep.subr.bf16.mxu0 %v2450_v0 }
 0x297   :  { %v369_v60 = vpop.f32.mrb[8].mxu0 }
 0x298   :  { %v375_v61 = vadd.f32 %v369_v60, %v189_v59  ;;  %v1895_v62 = vpop.f32.mrb[9].mxu0 }
 0x299   :  { %v372_v63 = vpop.f32.mrb[10].mxu0 }
 0x29a   :  { %v1614_v1 = vmul.f32 -1.442695, %v375_v61  ;;  %2278 = vtanh.f32 %v375_v61  ;;  %v1896_v3 = vpop.f32.mrb[11].mxu0 }
 0x29c   :  { %2280 = vpow2.f32 %v1614_v1 }
 0x2a4   :  { %v2279_v5 = vpop.eup %2278 }
 0x2a5   :  { %385 = vrot.lane.b32.xlu0 %v2279_v5, %s2447_s7 }
 0x2a6   :  { %v2281_v7 = vpop.eup %2280 }
 0x2a7   :  { %v379_v9 = vadd.f32 1.0, %v2281_v7 }
 0x2a9   :  { %2282 = vrcp.f32 %v379_v9 }
 0x2b3   :  { %v2283_v11 = vpop.eup %2282 }
 0x2b4   :  { %383 = vrot.lane.b32.xlu1 %v2283_v11, %s2454_s17 }
 0x2b8   :  { %387 = vrot.lane.b32.xlu1 %v2283_v11, %s2453_s16 }
 0x317   :  { %v386_v12 = vpop.permute.xlu0 %385 }
 0x318   :  { %v390_v15 = vmul.f32 %v2283_v11, %v386_v12 }
 0x326   :  { %v384_v13 = vpop.permute.xlu1 %383 }
 0x327   :  { %v389_v16 = vmul.f32 %v384_v13, %v329_v50  ;;  %v202_v13 = vadd.f32 %v2604_v24, %v2652_v56 }
 0x329   :  { %v391_v18 = vadd.f32 %v390_v15, %v389_v16 }
 0x32a   :  { %v388_v21 = vpop.permute.xlu1 %387 }
 0x32b   :  { %2284 = vtanh.f32 %v391_v18 }
 0x335   :  { %v2285_v20 = vpop.eup %2284 }
 0x336   :  { %v2662_v22 = vmul.f32 %v2285_v20, %v388_v21 }
 0x338   :  { %v396_v26 = vpack.c.bf16 %v2662_v22, %v2662_v22 }
 0x33a   :  { %1914 = vmatmul.mubr.bf16.vlgmr.msra.gmra.mrb[4].mxu1 %v396_v26 }
 0x33b   :  { %1938 = vmatpush3.bf16.msra.mxu1 %v2521_v2  ;;  %1953 = vmatprep.mubr.msk.bf16.mxu1 %vm2451_vm0, %v2450_v0 }
 0x33c   :  { %1939 = vmatprep.subr.bf16.mxu1 %v2450_v0 }
 0x33f   :  { %1940 = vmatpush3.bf16.msra.mxu1 %v2524_v4 }
 0x340   :  { %1941 = vmatprep.subr.bf16.mxu1 %v2450_v0 }
 0x343   :  { %1942 = vmatpush3.bf16.msra.mxu1 %v2528_v6 }
 0x344   :  { %1943 = vmatprep.subr.bf16.mxu1 %v2450_v0 }
 0x347   :  { %1944 = vmatpush3.bf16.msra.mxu1 %v2532_v8 }
 0x348   :  { %1945 = vmatprep.subr.bf16.mxu1 %v2450_v0 }
 0x34b   :  { %1946 = vmatpush3.bf16.msra.mxu1 %v2536_v10 }
 0x34c   :  { %1947 = vmatprep.subr.bf16.mxu1 %v2450_v0 }
 0x34f   :  { %1948 = vmatpush3.bf16.msra.mxu1 %v2545_v14 }
 0x350   :  { %1949 = vmatprep.subr.bf16.mxu1 %v2450_v0 }
 0x353   :  { %1950 = vmatpush3.bf16.msra.mxu1 %v2549_v17 }
 0x354   :  { %1951 = vmatprep.subr.bf16.mxu1 %v2450_v0 }
 0x357   :  { %1952 = vmatpush3.bf16.msra.mxu1 %v2553_v19 }
 0x358   :  { %1977 = vmatprep.subr.bf16.mxu1 %v2450_v0 }
 0x40d   :  { %v431_v28 = vpop.f32.mrb[4].mxu1 }
 0x40e   :  { %v437_v29 = vadd.f32 %v431_v28, %v194_v27  ;;  %v1915_v31 = vpop.f32.mrb[5].mxu1 }
 0x40f   :  { %v434_v32 = vpop.f32.mrb[6].mxu1 }
 0x410   :  { %v1615_v33 = vmul.f32 -1.442695, %v437_v29  ;;  %2286 = vtanh.f32 %v437_v29  ;;  %v1916_v34 = vpop.f32.mrb[7].mxu1 }
 0x412   :  { %2288 = vpow2.f32 %v1615_v33 }
 0x41a   :  { %v2287_v35 = vpop.eup %2286 }
 0x41b   :  { %447 = vrot.lane.b32.xlu1 %v2287_v35, %s2447_s7 }
 0x41c   :  { %v2289_v36 = vpop.eup %2288 }
 0x41d   :  { %v441_v37 = vadd.f32 1.0, %v2289_v36 }
 0x41f   :  { %2290 = vrcp.f32 %v441_v37 }
 0x429   :  { %v2291_v38 = vpop.eup %2290 }
 0x42a   :  { %445 = vrot.lane.b32.xlu0 %v2291_v38, %s2454_s17 }
 0x42e   :  { %449 = vrot.lane.b32.xlu0 %v2291_v38, %s2453_s16 }
 0x48d   :  { %v448_v25 = vpop.permute.xlu1 %447 }
 0x48e   :  { %v452_v40 = vmul.f32 %v2291_v38, %v448_v25 }
 0x49c   :  { %v446_v39 = vpop.permute.xlu0 %445 }
 0x49d   :  { %v451_v41 = vmul.f32 %v446_v39, %v391_v18 }
 0x49f   :  { %v453_v42 = vadd.f32 %v452_v40, %v451_v41 }
 0x4a0   :  { %v450_v44 = vpop.permute.xlu0 %449 }
 0x4a1   :  { %2292 = vtanh.f32 %v453_v42 }
 0x4ab   :  { %v2293_v43 = vpop.eup %2292 }
 0x4ac   :  { %v2689_v45 = vmul.f32 %v2293_v43, %v450_v44 }
 0x4ae   :  { %v458_v46 = vpack.c.bf16 %v2689_v45, %v2689_v45 }
 0x4b0   :  { %1934 = vmatmul.mubr.bf16.vlgmr.msra.gmra.mrb[12].mxu0 %v458_v46 }
 0x4b1   :  { %1958 = vmatpush3.bf16.msra.mxu0 %v2521_v2  ;;  %1973 = vmatprep.mubr.msk.bf16.mxu0 %vm2451_vm0, %v2450_v0 }
 0x4b2   :  { %1959 = vmatprep.subr.bf16.mxu0 %v2450_v0 }
 0x4b5   :  { %1960 = vmatpush3.bf16.msra.mxu0 %v2524_v4 }
 0x4b6   :  { %1961 = vmatprep.subr.bf16.mxu0 %v2450_v0 }
 0x4b9   :  { %1962 = vmatpush3.bf16.msra.mxu0 %v2528_v6 }
 0x4ba   :  { %1963 = vmatprep.subr.bf16.mxu0 %v2450_v0 }
 0x4bd   :  { %1964 = vmatpush3.bf16.msra.mxu0 %v2532_v8 }
 0x4be   :  { %1965 = vmatprep.subr.bf16.mxu0 %v2450_v0 }
 0x4c1   :  { %1966 = vmatpush3.bf16.msra.mxu0 %v2536_v10 }
 0x4c2   :  { %1967 = vmatprep.subr.bf16.mxu0 %v2450_v0 }
 0x4c5   :  { %1968 = vmatpush3.bf16.msra.mxu0 %v2545_v14 }
 0x4c6   :  { %1969 = vmatprep.subr.bf16.mxu0 %v2450_v0 }
 0x4c9   :  { %1970 = vmatpush3.bf16.msra.mxu0 %v2549_v17 }
 0x4ca   :  { %1971 = vmatprep.subr.bf16.mxu0 %v2450_v0 }
 0x4cd   :  { %1972 = vmatpush3.bf16.msra.mxu0 %v2553_v19 }
 0x4ce   :  { %1997 = vmatprep.subr.bf16.mxu0 %v2450_v0 }
 0x583   :  { %v493_v48 = vpop.f32.mrb[12].mxu0 }
 0x584   :  { %v499_v49 = vadd.f32 %v493_v48, %v197_v47  ;;  %v1935_v50 = vpop.f32.mrb[13].mxu0 }
 0x585   :  { %v496_v51 = vpop.f32.mrb[14].mxu0 }
 0x586   :  { %v1616_v52 = vmul.f32 -1.442695, %v499_v49  ;;  %2294 = vtanh.f32 %v499_v49  ;;  %v1936_v54 = vpop.f32.mrb[15].mxu0 }
 0x587   :  { %v811_v54 = vpack.c.bf16 %v2662_v22, %v2628_v53  ;;  %v2253_v53 = vld [vmem:[#allocation4 + $0x78] sm:$0xff]  }
 0x588   :  { %2296 = vpow2.f32 %v1616_v52  ;;  %v2247_v52 = vld [vmem:[#allocation4 + $0x48] sm:$0xff]  }
 0x590   :  { %v2295_v59 = vpop.eup %2294 }
 0x591   :  { %509 = vrot.lane.b32.xlu0 %v2295_v59, %s2447_s7  ;;  %v2248_v59 = vld [vmem:[#allocation4 + $0x50] sm:$0xff]  }
 0x592   :  { %v2297_v60 = vpop.eup %2296 }
 0x593   :  { %v503_v61 = vadd.f32 1.0, %v2297_v60  ;;  %v2249_v60 = vld [vmem:[#allocation4 + $0x58] sm:$0xff]  }
 0x595   :  { %2298 = vrcp.f32 %v503_v61  ;;  %v2250_v61 = vld [vmem:[#allocation4 + $0x60] sm:$0xff]  }
 0x59f   :  { %v2299_v62 = vpop.eup %2298 }
 0x5a0   :  { %507 = vrot.lane.b32.xlu1 %v2299_v62, %s2454_s17 }
 0x5a4   :  { %511 = vrot.lane.b32.xlu1 %v2299_v62, %s2453_s16 }
 0x603   :  { %v510_v30 = vpop.permute.xlu0 %509 }
 0x604   :  { %v514_v1 = vmul.f32 %v2299_v62, %v510_v30  ;;  %v2251_v62 = vld [vmem:[#allocation4 + $0x68] sm:$0xff]   ;;  %v2252_v30 = vld [vmem:[#allocation4 + $0x70] sm:$0xff]  }
 0x612   :  { %v508_v63 = vpop.permute.xlu1 %507 }
 0x613   :  { %v513_v3 = vmul.f32 %v508_v63, %v453_v42  ;;  %v2246_v42 = vld [vmem:[#allocation4 + $0x40] sm:$0xff]  }
 0x615   :  { %v515_v5 = vadd.f32 %v514_v1, %v513_v3  ;;  %v210_v1 = vadd.f32 %v2650_v55, %v2604_v24 }
 0x616   :  { %v512_v9 = vpop.permute.xlu1 %511 }
 0x617   :  { %2300 = vtanh.f32 %v515_v5 }
 0x621   :  { %v2301_v7 = vpop.eup %2300 }
 0x622   :  { %v2716_v11 = vmul.f32 %v2301_v7, %v512_v9 }
 0x624   :  { %v520_v12 = vpack.c.bf16 %v2716_v11, %v2716_v11  ;;  %v812_v22 = vpack.c.bf16 %v2716_v11, %v2689_v45 }
 0x626   :  { %1954 = vmatmul.mubr.bf16.vlgmr.msra.gmra.mrb[8].mxu1 %v520_v12 }
 0x627   :  { %1978 = vmatpush3.bf16.msra.mxu1 %v2521_v2  ;;  %1993 = vmatprep.mubr.msk.bf16.mxu1 %vm2451_vm0, %v2450_v0 }
 0x628   :  { %1979 = vmatprep.subr.bf16.mxu1 %v2450_v0 }
 0x62b   :  { %1980 = vmatpush3.bf16.msra.mxu1 %v2524_v4 }
 0x62c   :  { %1981 = vmatprep.subr.bf16.mxu1 %v2450_v0 }
 0x62f   :  { %1982 = vmatpush3.bf16.msra.mxu1 %v2528_v6 }
 0x630   :  { %1983 = vmatprep.subr.bf16.mxu1 %v2450_v0 }
 0x633   :  { %1984 = vmatpush3.bf16.msra.mxu1 %v2532_v8 }
 0x634   :  { %1985 = vmatprep.subr.bf16.mxu1 %v2450_v0 }
 0x637   :  { %1986 = vmatpush3.bf16.msra.mxu1 %v2536_v10 }
 0x638   :  { %1987 = vmatprep.subr.bf16.mxu1 %v2450_v0 }
 0x63b   :  { %1988 = vmatpush3.bf16.msra.mxu1 %v2545_v14 }
 0x63c   :  { %1989 = vmatprep.subr.bf16.mxu1 %v2450_v0 }
 0x63f   :  { %1990 = vmatpush3.bf16.msra.mxu1 %v2549_v17 }
 0x640   :  { %1991 = vmatprep.subr.bf16.mxu1 %v2450_v0 }
 0x643   :  { %1992 = vmatpush3.bf16.msra.mxu1 %v2553_v19 }
 0x644   :  { %2017 = vmatprep.subr.bf16.mxu1 %v2246_v42 }
 0x6f9   :  { %v555_v15 = vpop.f32.mrb[8].mxu1 }
 0x6fa   :  { %v561_v16 = vadd.f32 %v555_v15, %v202_v13  ;;  %v1955_v18 = vpop.f32.mrb[9].mxu1 }
 0x6fb   :  { %v558_v20 = vpop.f32.mrb[10].mxu1 }
 0x6fc   :  { %v1617_v21 = vmul.f32 -1.442695, %v561_v16  ;;  %2302 = vtanh.f32 %v561_v16  ;;  %v1956_v26 = vpop.f32.mrb[11].mxu1 }
 0x6fe   :  { %2304 = vpow2.f32 %v1617_v21  ;;  %v2789_v21 = vld [vmem:[#allocation6 + $0x40] sm:$0xff]  }
 0x706   :  { %v2303_v27 = vpop.eup %2302 }
 0x707   :  { %571 = vrot.lane.b32.xlu1 %v2303_v27, %s2447_s7  ;;  %v2795_v27 = vld [vmem:[#allocation6 + $0x48] sm:$0xff]  }
 0x708   :  { %v2305_v28 = vpop.eup %2304 }
 0x709   :  { %v565_v29 = vadd.f32 1.0, %v2305_v28  ;;  %v2799_v28 = vld [vmem:[#allocation6 + $0x50] sm:$0xff]  }
 0x70b   :  { %2306 = vrcp.f32 %v565_v29  ;;  %v2803_v29 = vld [vmem:[#allocation6 + $0x58] sm:$0xff]  }
 0x715   :  { %v2307_v31 = vpop.eup %2306 }
 0x716   :  { %569 = vrot.lane.b32.xlu0 %v2307_v31, %s2454_s17 }
 0x71a   :  { %573 = vrot.lane.b32.xlu0 %v2307_v31, %s2453_s16 }
 0x779   :  { %v572_v56 = vpop.permute.xlu1 %571 }
 0x77a   :  { %v576_v33 = vmul.f32 %v2307_v31, %v572_v56  ;;  %v2807_v31 = vld [vmem:[#allocation6 + $0x60] sm:$0xff]   ;;  %v2811_v56 = vld [vmem:[#allocation6 + $0x68] sm:$0xff]  }
 0x788   :  { %v570_v32 = vpop.permute.xlu0 %569 }
 0x789   :  { %v575_v34 = vmul.f32 %v570_v32, %v515_v5  ;;  %v2815_v32 = vld [vmem:[#allocation6 + $0x70] sm:$0xff]  }
 0x78b   :  { %v577_v35 = vadd.f32 %v576_v33, %v575_v34  ;;  %v2819_v33 = vld [vmem:[#allocation6 + $0x78] sm:$0xff]  }
 0x78c   :  { %v574_v37 = vpop.permute.xlu0 %573 }
 0x78d   :  { %2308 = vtanh.f32 %v577_v35 }
 0x797   :  { %v2309_v36 = vpop.eup %2308 }
 0x798   :  { %v2742_v38 = vmul.f32 %v2309_v36, %v574_v37 }
 0x79a   :  { %v582_v25 = vpack.c.bf16 %v2742_v38, %v2742_v38 }
 0x79c   :  { %1974 = vmatmul.mubr.bf16.vlgmr.msra.gmra.mrb[16].mxu0 %v582_v25 }
 0x79d   :  { %1998 = vmatpush3.bf16.msra.mxu0 %v2521_v2  ;;  %2013 = vmatprep.mubr.msk.bf16.mxu0 %vm2451_vm0, %v2450_v0  ;;  %v205_v2 = vadd.f32 %v2604_v24, %v2656_v58 }
 0x79e   :  { %1999 = vmatprep.subr.bf16.mxu0 %v2450_v0 }
 0x7a1   :  { %2000 = vmatpush3.bf16.msra.mxu0 %v2524_v4 }
 0x7a2   :  { %2001 = vmatprep.subr.bf16.mxu0 %v2450_v0 }
 0x7a5   :  { %2002 = vmatpush3.bf16.msra.mxu0 %v2528_v6 }
 0x7a6   :  { %2003 = vmatprep.subr.bf16.mxu0 %v2450_v0 }
 0x7a9   :  { %2004 = vmatpush3.bf16.msra.mxu0 %v2532_v8 }
 0x7aa   :  { %2005 = vmatprep.subr.bf16.mxu0 %v2450_v0 }
 0x7ad   :  { %2006 = vmatpush3.bf16.msra.mxu0 %v2536_v10 }
 0x7ae   :  { %2007 = vmatprep.subr.bf16.mxu0 %v2450_v0 }
 0x7b1   :  { %2008 = vmatpush3.bf16.msra.mxu0 %v2545_v14 }
 0x7b2   :  { %2009 = vmatprep.subr.bf16.mxu0 %v2450_v0 }
 0x7b5   :  { %2010 = vmatpush3.bf16.msra.mxu0 %v2549_v17 }
 0x7b6   :  { %2011 = vmatprep.subr.bf16.mxu0 %v2450_v0 }
 0x7b9   :  { %2012 = vmatpush3.bf16.msra.mxu0 %v2553_v19 }
 0x7ba   :  { %2041 = vmatprep.subr.bf16.mxu0 %v2450_v0 }
 0x86f   :  { %v617_v4 = vpop.f32.mrb[16].mxu0 }
 0x870   :  { %v623_v6 = vadd.f32 %v617_v4, %v205_v2  ;;  %v1975_v8 = vpop.f32.mrb[17].mxu0 }
 0x871   :  { %v620_v10 = vpop.f32.mrb[18].mxu0 }
 0x872   :  { %v1618_v39 = vmul.f32 -1.442695, %v623_v6  ;;  %2310 = vtanh.f32 %v623_v6  ;;  %v1976_v14 = vpop.f32.mrb[19].mxu0 }
 0x874   :  { %2312 = vpow2.f32 %v1618_v39 }
 0x87c   :  { %v2311_v40 = vpop.eup %2310 }
 0x87d   :  { %633 = vrot.lane.b32.xlu0 %v2311_v40, %s2447_s7 }
 0x87e   :  { %v2313_v17 = vpop.eup %2312 }
 0x87f   :  { %v627_v41 = vadd.f32 1.0, %v2313_v17 }
 0x881   :  { %2314 = vrcp.f32 %v627_v41 }
 0x88b   :  { %v2315_v19 = vpop.eup %2314 }
 0x88c   :  { %631 = vrot.lane.b32.xlu1 %v2315_v19, %s2454_s17 }
 0x890   :  { %635 = vrot.lane.b32.xlu1 %v2315_v19, %s2453_s16 }
 0x8ef   :  { %v634_v58 = vpop.permute.xlu0 %633 }
 0x8f0   :  { %v638_v44 = vmul.f32 %v2315_v19, %v634_v58 }
 0x8fe   :  { %v632_v43 = vpop.permute.xlu1 %631 }
 0x8ff   :  { %v637_v46 = vmul.f32 %v632_v43, %v577_v35  ;;  %v2874_v43 = vld [vmem:[%s3061_s3 + $0x1] ss:$0 sm:$0xff] }
 0x901   :  { %v2769_v47 = vadd.f32 %v638_v44, %v637_v46 }
 0x902   :  { %v636_v49 = vpop.permute.xlu1 %635 }
 0x903   :  { %2316 = vtanh.f32 %v2769_v47 }
 0x90d   :  { %v2317_v48 = vpop.eup %2316 }
 0x90e   :  { %v641_v50 = vmul.f32 %v2317_v48, %v636_v49 }
 0x910   :  { %v644_v51 = vpack.c.bf16 %v641_v50, %v641_v50  ;;  %v813_v63 = vpack.c.bf16 %v641_v50, %v2742_v38 }
 0x912   :  { %1994 = vmatmul.mubr.bf16.vlgmr.msra.gmra.mrb[12].mxu1 %v644_v51 }
 0x913   :  { %2018 = vmatpush3.bf16.msra.mxu1 %v2246_v42  ;;  %2033 = vmatprep.mubr.bf16.mxu1 %v811_v54 }
 0x914   :  { %2019 = vmatprep.subr.bf16.mxu1 %v2247_v52 }
 0x917   :  { %2020 = vmatpush3.bf16.msra.mxu1 %v2247_v52 }
 0x918   :  { %2021 = vmatprep.subr.bf16.mxu1 %v2248_v59 }
 0x91b   :  { %2022 = vmatpush3.bf16.msra.mxu1 %v2248_v59 }
 0x91c   :  { %2023 = vmatprep.subr.bf16.mxu1 %v2249_v60 }
 0x91f   :  { %2024 = vmatpush3.bf16.msra.mxu1 %v2249_v60 }
 0x920   :  { %2025 = vmatprep.subr.bf16.mxu1 %v2250_v61 }
 0x923   :  { %2026 = vmatpush3.bf16.msra.mxu1 %v2250_v61 }
 0x924   :  { %2027 = vmatprep.subr.bf16.mxu1 %v2251_v62 }
 0x927   :  { %2028 = vmatpush3.bf16.msra.mxu1 %v2251_v62 }
 0x928   :  { %2029 = vmatprep.subr.bf16.mxu1 %v2252_v30 }
 0x92b   :  { %2030 = vmatpush3.bf16.msra.mxu1 %v2252_v30 }
 0x92c   :  { %2031 = vmatprep.subr.bf16.mxu1 %v2253_v53 }
 0x92f   :  { %2032 = vmatpush3.bf16.msra.mxu1 %v2253_v53 }
 0x930   :  { %2061 = vmatprep.subr.bf16.mxu1 %v2450_v0 }
 0x932   :  { %2034 = vmatmul.mubr.bf16.vlgmr.msra.gmra.mrb[16].mxu1 %v812_v22 }
 0x933   :  { %2037 = vmatprep.mubr.bf16.mxu1 %v813_v63  ;;  %2062 = vmatpush3.bf16.msra.mxu1 %v2789_v21 }
 0x934   :  { %2063 = vmatprep.subr.bf16.mxu1 %v2450_v0 }
 0x937   :  { %2064 = vmatpush3.bf16.msra.mxu1 %v2795_v27 }
 0x938   :  { %2065 = vmatprep.subr.bf16.mxu1 %v2450_v0 }
 0x93b   :  { %2066 = vmatpush3.bf16.msra.mxu1 %v2799_v28 }
 0x93c   :  { %2067 = vmatprep.subr.bf16.mxu1 %v2450_v0 }
 0x93f   :  { %2068 = vmatpush3.bf16.msra.mxu1 %v2803_v29 }
 0x940   :  { %2069 = vmatprep.subr.bf16.mxu1 %v2450_v0 }
 0x943   :  { %2070 = vmatpush3.bf16.msra.mxu1 %v2807_v31 }
 0x944   :  { %2071 = vmatprep.subr.bf16.mxu1 %v2450_v0 }
 0x947   :  { %2072 = vmatpush3.bf16.msra.mxu1 %v2811_v56 }
 0x948   :  { %2073 = vmatprep.subr.bf16.mxu1 %v2450_v0 }
 0x94b   :  { %2074 = vmatpush3.bf16.msra.mxu1 %v2815_v32 }
 0x94c   :  { %2075 = vmatprep.subr.bf16.mxu1 %v2450_v0 }
 0x94f   :  { %2076 = vmatpush3.bf16.msra.mxu1 %v2819_v33 }
 0x950   :  { %2101 = vmatprep.subr.bf16.mxu1 %v2450_v0 }
 0x9e5   :  { %v679_v3 = vpop.f32.mrb[12].mxu1 }
 0x9e6   :  { %v685_v5 = vadd.f32 %v679_v3, %v210_v1  ;;  %v1995_v7 = vpop.f32.mrb[13].mxu1 }
 0x9e7   :  { %v682_v9 = vpop.f32.mrb[14].mxu1 }
 0x9e8   :  { %v1619_v12 = vmul.f32 -1.442695, %v685_v5  ;;  %2318 = vtanh.f32 %v685_v5  ;;  %v1996_v13 = vpop.f32.mrb[15].mxu1 }
 0x9ea   :  { %2320 = vpow2.f32 %v1619_v12 }
 0x9f2   :  { %v2319_v15 = vpop.eup %2318 }
 0x9f3   :  { %695 = vrot.lane.b32.xlu1 %v2319_v15, %s2447_s7 }
 0x9f4   :  { %v2321_v45 = vpop.eup %2320 }
 0x9f5   :  { %v689_v11 = vadd.f32 1.0, %v2321_v45 }
 0x9f7   :  { %2322 = vrcp.f32 %v689_v11 }
 0xa01   :  { %v2323_v16 = vpop.eup %2322 }
 0xa02   :  { %693 = vrot.lane.b32.xlu0 %v2323_v16, %s2454_s17 }
 0xa05   :  { %v2782_v18 = vpop.f32.mrb[16].mxu1 }
 0xa06   :  { %v2784_v55 = vpop.f32.mrb[17].mxu1  ;;  %697 = vrot.lane.b32.xlu0 %v2323_v16, %s2453_s16 }
 0xa07   :  { %v2787_v20 = vpop.f32.mrb[18].mxu1 }
 0xa08   :  { %v2791_v26 = vpop.f32.mrb[19].mxu1 }
 0xa65   :  { %v696_v34 = vpop.permute.xlu1 %695 }
 0xa66   :  { %v700_v36 = vmul.f32 %v2323_v16, %v696_v34 }
 0xa74   :  { %v694_v35 = vpop.permute.xlu0 %693 }
 0xa75   :  { %v699_v37 = vmul.f32 %v694_v35, %v2769_v47 }
 0xa77   :  { %v2824_v38 = vadd.f32 %v700_v36, %v699_v37  ;;  %v907_v36 = vadd.f32 %v2874_v43, %v2791_v26 }
 0xa78   :  { %v698_v2 = vpop.permute.xlu0 %697 }
 0xa79   :  { %2324 = vtanh.f32 %v2824_v38 }
 0xa83   :  { %v2325_v25 = vpop.eup %2324 }
 0xa84   :  { %v2827_v4 = vmul.f32 %v2325_v25, %v698_v2 }
 0xa86   :  { %v706_v6 = vpack.c.bf16 %v2827_v4, %v2827_v4 }
 0xa88   :  { %2014 = vmatmul.mubr.bf16.vlgmr.msra.gmra.mrb[20].mxu0 %v706_v6 }
 0xa89   :  { %2042 = vmatpush3.bf16.msra.mxu0 %v2789_v21  ;;  %2057 = vmatprep.mubr.msk.bf16.mxu0 %vm2451_vm0, %v2450_v0 }
 0xa8a   :  { %2043 = vmatprep.subr.bf16.mxu0 %v2450_v0 }
 0xa8d   :  { %2044 = vmatpush3.bf16.msra.mxu0 %v2795_v27 }
 0xa8e   :  { %2045 = vmatprep.subr.bf16.mxu0 %v2450_v0 }
 0xa91   :  { %2046 = vmatpush3.bf16.msra.mxu0 %v2799_v28 }
 0xa92   :  { %2047 = vmatprep.subr.bf16.mxu0 %v2450_v0 }
 0xa95   :  { %2048 = vmatpush3.bf16.msra.mxu0 %v2803_v29 }
 0xa96   :  { %2049 = vmatprep.subr.bf16.mxu0 %v2450_v0 }
 0xa99   :  { %2050 = vmatpush3.bf16.msra.mxu0 %v2807_v31 }
 0xa9a   :  { %2051 = vmatprep.subr.bf16.mxu0 %v2450_v0 }
 0xa9d   :  { %2052 = vmatpush3.bf16.msra.mxu0 %v2811_v56 }
 0xa9e   :  { %2053 = vmatprep.subr.bf16.mxu0 %v2450_v0 }
 0xaa1   :  { %2054 = vmatpush3.bf16.msra.mxu0 %v2815_v32 }
 0xaa2   :  { %2055 = vmatprep.subr.bf16.mxu0 %v2450_v0 }
 0xaa5   :  { %2056 = vmatpush3.bf16.msra.mxu0 %v2819_v33 }
 0xaa6   :  { %2081 = vmatprep.subr.bf16.mxu0 %v2450_v0 }
 0xaa8   :  { %2058 = vmatmul.mubr.bf16.vlgmr.msra.gmra.mrb[24].mxu0 %v2452_v23  ;;  %v213_v23 = vadd.f32 %v2654_v57, %v2604_v24  ;;  %v904_v24 = vadd.f32 %v2874_v43, %v2784_v55 }
 0xaa9   :  { %2082 = vmatpush3.bf16.msra.mxu0 %v2789_v21  ;;  %2097 = vmatprep.mubr.msk.bf16.mxu0 %vm2451_vm0, %v2450_v0 }
 0xaaa   :  { %2083 = vmatprep.subr.bf16.mxu0 %v2450_v0 }
 0xaad   :  { %2084 = vmatpush3.bf16.msra.mxu0 %v2795_v27 }
 0xaae   :  { %2085 = vmatprep.subr.bf16.mxu0 %v2450_v0 }
 0xab1   :  { %2086 = vmatpush3.bf16.msra.mxu0 %v2799_v28 }
 0xab2   :  { %2087 = vmatprep.subr.bf16.mxu0 %v2450_v0 }
 0xab5   :  { %2088 = vmatpush3.bf16.msra.mxu0 %v2803_v29 }
 0xab6   :  { %2089 = vmatprep.subr.bf16.mxu0 %v2450_v0 }
 0xab9   :  { %2090 = vmatpush3.bf16.msra.mxu0 %v2807_v31 }
 0xaba   :  { %2091 = vmatprep.subr.bf16.mxu0 %v2450_v0 }
 0xabd   :  { %2092 = vmatpush3.bf16.msra.mxu0 %v2811_v56 }
 0xabe   :  { %2093 = vmatprep.subr.bf16.mxu0 %v2450_v0 }
 0xac1   :  { %2094 = vmatpush3.bf16.msra.mxu0 %v2815_v32 }
 0xac2   :  { %2095 = vmatprep.subr.bf16.mxu0 %v2450_v0 }
 0xac5   :  { %2096 = vmatpush3.bf16.msra.mxu0 %v2819_v33 }
 0xac6   :  { %2121 = vmatprep.subr.bf16.mxu0 %v2450_v0 }
 0xb5b   :  { %v741_v8 = vpop.f32.mrb[20].mxu0 }
 0xb5c   :  { %v747_v10 = vadd.f32 %v741_v8, %v213_v23  ;;  %v2015_v39 = vpop.f32.mrb[21].mxu0 }
 0xb5d   :  { %v744_v14 = vpop.f32.mrb[22].mxu0 }
 0xb5e   :  { %v1620_v40 = vmul.f32 -1.442695, %v747_v10  ;;  %2326 = vtanh.f32 %v747_v10  ;;  %v2016_v17 = vpop.f32.mrb[23].mxu0 }
 0xb60   :  { %2328 = vpow2.f32 %v1620_v40 }
 0xb68   :  { %v2327_v41 = vpop.eup %2326 }
 0xb69   :  { %757 = vrot.lane.b32.xlu0 %v2327_v41, %s2447_s7 }
 0xb6a   :  { %v2329_v19 = vpop.eup %2328 }
 0xb6b   :  { %v751_v42 = vadd.f32 1.0, %v2329_v19 }
 0xb6d   :  { %2330 = vrcp.f32 %v751_v42 }
 0xb77   :  { %v2331_v58 = vpop.eup %2330 }
 0xb78   :  { %755 = vrot.lane.b32.xlu1 %v2331_v58, %s2454_s17 }
 0xb7b   :  { %v1025_v57 = vpop.f32.mrb[24].mxu0 }
 0xb7c   :  { %v1031_v44 = vadd.f32 %v1025_v57, %v904_v24  ;;  %v2059_v46 = vpop.f32.mrb[25].mxu0  ;;  %v912_v57 = vadd.f32 %v2782_v18, %v2874_v43 }
 0xb7d   :  { %v1028_v47 = vpop.f32.mrb[26].mxu0 }
 0xb7e   :  { %v1639_v48 = vmul.f32 -1.442695, %v1031_v44  ;;  %2332 = vtanh.f32 %v1031_v44  ;;  %v2060_v49 = vpop.f32.mrb[27].mxu0 }
 0xb80   :  { %2334 = vpow2.f32 %v1639_v48 }
 0xb88   :  { %v2333_v50 = vpop.eup %2332 }
 0xb89   :  { %1041 = vrot.lane.b32.xlu0 %v2333_v50, %s2447_s7 }
 0xb8a   :  { %v2335_v51 = vpop.eup %2334 }
 0xb8b   :  { %v1035_v52 = vadd.f32 1.0, %v2335_v51 }
 0xb8d   :  { %2336 = vrcp.f32 %v1035_v52 }
 0xb97   :  { %v2337_v54 = vpop.eup %2336 }
 0xb98   :  { %1043 = vrot.lane.b32.xlu0 %v2337_v54, %s2453_s16  ;;  %1039 = vrot.lane.b32.xlu1 %v2337_v54, %s2454_s17 }
 0xb9c   :  { %759 = vrot.lane.b32.xlu1 %v2331_v58, %s2453_s16 }
 0xbdb   :  { %v758_v60 = vpop.permute.xlu0 %757 }
 0xbdc   :  { %v762_v62 = vmul.f32 %v2331_v58, %v758_v60 }
 0xbea   :  { %v756_v59 = vpop.permute.xlu1 %755 }
 0xbeb   :  { %v761_v61 = vmul.f32 %v756_v59, %v2824_v38 }
 0xbed   :  { %v763_v30 = vadd.f32 %v762_v62, %v761_v61 }
 0xbef   :  { %2338 = vtanh.f32 %v763_v30 }
 0xbf9   :  { %v2339_v5 = vpop.eup %2338 }
 0xbfb   :  { %v1042_v53 = vpop.permute.xlu0 %1041 }
 0xbfc   :  { %v1046_v63 = vmul.f32 %v2337_v54, %v1042_v53 }
 0xc0a   :  { %v1040_v22 = vpop.permute.xlu1 %1039  ;;  %v1044_v15 = vpop.permute.xlu0 %1043 }
 0xc0b   :  { %v1045_v1 = vmul.f32 0.0, %v1040_v22 }
 0xc0d   :  { %v1047_v3 = vadd.f32 %v1046_v63, %v1045_v1 }
 0xc0e   :  { %v760_v7 = vpop.permute.xlu1 %759 }
 0xc0f   :  { %2340 = vtanh.f32 %v1047_v3  ;;  %v765_v9 = vmul.f32 %v2339_v5, %v760_v7 }
 0xc11   :  { %v814_v12 = vpack.c.bf16 %v765_v9, %v2827_v4 }
 0xc13   :  { %2038 = vmatmul.mubr.bf16.gmra.mrb[20].mxu1 %v814_v12 }
 0xc14   :  { %2077 = vmatprep.mubr.msk.bf16.mxu1 %vm2451_vm0, %v2450_v0 }
 0xc19   :  { %v2341_v13 = vpop.eup %2340 }
 0xc1a   :  { %v1049_v45 = vmul.f32 %v2341_v13, %v1044_v15 }
 0xc1c   :  { %v1051_v11 = vpack.c.bf16 %v1049_v45, %v1049_v45 }
 0xc1e   :  { %2078 = vmatmul.mubr.bf16.vlgmr.msra.gmra.mrb[24].mxu1 %v1051_v11 }
 0xc1f   :  { %2102 = vmatpush3.bf16.msra.mxu1 %v2789_v21  ;;  %2117 = vmatprep.mubr.msk.bf16.mxu1 %vm2451_vm0, %v2450_v0 }
 0xc20   :  { %2103 = vmatprep.subr.bf16.mxu1 %v2450_v0 }
 0xc23   :  { %2104 = vmatpush3.bf16.msra.mxu1 %v2795_v27 }
 0xc24   :  { %2105 = vmatprep.subr.bf16.mxu1 %v2450_v0 }
 0xc27   :  { %2106 = vmatpush3.bf16.msra.mxu1 %v2799_v28 }
 0xc28   :  { %2107 = vmatprep.subr.bf16.mxu1 %v2450_v0 }
 0xc2b   :  { %2108 = vmatpush3.bf16.msra.mxu1 %v2803_v29 }
 0xc2c   :  { %2109 = vmatprep.subr.bf16.mxu1 %v2450_v0 }
 0xc2f   :  { %2110 = vmatpush3.bf16.msra.mxu1 %v2807_v31 }
 0xc30   :  { %2111 = vmatprep.subr.bf16.mxu1 %v2450_v0 }
 0xc33   :  { %2112 = vmatpush3.bf16.msra.mxu1 %v2811_v56 }
 0xc34   :  { %2113 = vmatprep.subr.bf16.mxu1 %v2450_v0 }
 0xc37   :  { %2114 = vmatpush3.bf16.msra.mxu1 %v2815_v32 }
 0xc38   :  { %2115 = vmatprep.subr.bf16.mxu1 %v2450_v0 }
 0xc3b   :  { %2116 = vmatpush3.bf16.msra.mxu1 %v2819_v33 }
 0xc3c   :  { %2141 = vmatprep.subr.bf16.mxu1 %v2450_v0 }
 0xce6   :  { %v2905_v16 = vpop.f32.mrb[20].mxu1 }
 0xce7   :  { %v2907_v55 = vpop.f32.mrb[21].mxu1 }
 0xce8   :  { %v2909_v34 = vpop.f32.mrb[22].mxu1 }
 0xce9   :  { %v2911_v35 = vpop.f32.mrb[23].mxu1 }
 0xcf1   :  { %v1086_v37 = vpop.f32.mrb[24].mxu1 }
 0xcf2   :  { %v1092_v38 = vadd.f32 %v1086_v37, %v907_v36  ;;  %v2079_v25 = vpop.f32.mrb[25].mxu1 }
 0xcf3   :  { %v1089_v2 = vpop.f32.mrb[26].mxu1 }
 0xcf4   :  { %v1640_v4 = vmul.f32 -1.442695, %v1092_v38  ;;  %2342 = vtanh.f32 %v1092_v38  ;;  %v2080_v6 = vpop.f32.mrb[27].mxu1 }
 0xcf6   :  { %2344 = vpow2.f32 %v1640_v4 }
 0xcfe   :  { %v2343_v23 = vpop.eup %2342 }
 0xcff   :  { %1102 = vrot.lane.b32.xlu0 %v2343_v23, %s2447_s7 }
 0xd00   :  { %v2345_v8 = vpop.eup %2344 }
 0xd01   :  { %v1096_v10 = vadd.f32 1.0, %v2345_v8 }
 0xd03   :  { %2346 = vrcp.f32 %v1096_v10 }
 0xd0d   :  { %v2347_v39 = vpop.eup %2346 }
 0xd0e   :  { %1100 = vrot.lane.b32.xlu1 %v2347_v39, %s2454_s17 }
 0xd12   :  { %1104 = vrot.lane.b32.xlu1 %v2347_v39, %s2453_s16 }
 0xd71   :  { %v1103_v26 = vpop.permute.xlu0 %1102 }
 0xd72   :  { %v1107_v40 = vmul.f32 %v2347_v39, %v1103_v26  ;;  %v920_v39 = vadd.f32 %v2874_v43, %v2907_v55 }
 0xd80   :  { %v1101_v14 = vpop.permute.xlu1 %1100 }
 0xd81   :  { %v1106_v17 = vmul.f32 %v1101_v14, %v1047_v3  ;;  %v915_v3 = vadd.f32 %v2787_v20, %v2874_v43 }
 0xd83   :  { %v1108_v41 = vadd.f32 %v1107_v40, %v1106_v17 }
 0xd84   :  { %v1105_v42 = vpop.permute.xlu1 %1104 }
 0xd85   :  { %2348 = vtanh.f32 %v1108_v41 }
 0xd8f   :  { %v2349_v19 = vpop.eup %2348 }
 0xd90   :  { %v1110_v58 = vmul.f32 %v2349_v19, %v1105_v42 }
 0xd92   :  { %v1112_v24 = vpack.c.bf16 %v1110_v58, %v1110_v58 }
 0xd94   :  { %2098 = vmatmul.mubr.bf16.vlgmr.msra.gmra.mrb[28].mxu0 %v1112_v24 }
 0xd95   :  { %2122 = vmatpush3.bf16.msra.mxu0 %v2789_v21  ;;  %2137 = vmatprep.mubr.msk.bf16.mxu0 %vm2451_vm0, %v2450_v0 }
 0xd96   :  { %2123 = vmatprep.subr.bf16.mxu0 %v2450_v0 }
 0xd99   :  { %2124 = vmatpush3.bf16.msra.mxu0 %v2795_v27 }
 0xd9a   :  { %2125 = vmatprep.subr.bf16.mxu0 %v2450_v0 }
 0xd9d   :  { %2126 = vmatpush3.bf16.msra.mxu0 %v2799_v28 }
 0xd9e   :  { %2127 = vmatprep.subr.bf16.mxu0 %v2450_v0 }
 0xda1   :  { %2128 = vmatpush3.bf16.msra.mxu0 %v2803_v29 }
 0xda2   :  { %2129 = vmatprep.subr.bf16.mxu0 %v2450_v0 }
 0xda5   :  { %2130 = vmatpush3.bf16.msra.mxu0 %v2807_v31 }
 0xda6   :  { %2131 = vmatprep.subr.bf16.mxu0 %v2450_v0 }
 0xda9   :  { %2132 = vmatpush3.bf16.msra.mxu0 %v2811_v56 }
 0xdaa   :  { %2133 = vmatprep.subr.bf16.mxu0 %v2450_v0 }
 0xdad   :  { %2134 = vmatpush3.bf16.msra.mxu0 %v2815_v32 }
 0xdae   :  { %2135 = vmatprep.subr.bf16.mxu0 %v2450_v0 }
 0xdb1   :  { %2136 = vmatpush3.bf16.msra.mxu0 %v2819_v33 }
 0xdb2   :  { %2161 = vmatprep.subr.bf16.mxu0 %v2450_v0 }
 0xe67   :  { %v1147_v44 = vpop.f32.mrb[28].mxu0 }
 0xe68   :  { %v1153_v46 = vadd.f32 %v1147_v44, %v912_v57  ;;  %v2099_v47 = vpop.f32.mrb[29].mxu0 }
 0xe69   :  { %v1150_v48 = vpop.f32.mrb[30].mxu0 }
 0xe6a   :  { %v1641_v49 = vmul.f32 -1.442695, %v1153_v46  ;;  %2350 = vtanh.f32 %v1153_v46  ;;  %v2100_v50 = vpop.f32.mrb[31].mxu0 }
 0xe6c   :  { %2352 = vpow2.f32 %v1641_v49 }
 0xe74   :  { %v2351_v51 = vpop.eup %2350 }
 0xe75   :  { %1163 = vrot.lane.b32.xlu1 %v2351_v51, %s2447_s7 }
 0xe76   :  { %v2353_v52 = vpop.eup %2352 }
 0xe77   :  { %v1157_v54 = vadd.f32 1.0, %v2353_v52 }
 0xe79   :  { %2354 = vrcp.f32 %v1157_v54 }
 0xe83   :  { %v2355_v59 = vpop.eup %2354 }
 0xe84   :  { %1161 = vrot.lane.b32.xlu0 %v2355_v59, %s2454_s17 }
 0xe88   :  { %1165 = vrot.lane.b32.xlu0 %v2355_v59, %s2453_s16 }
 0xee7   :  { %v1164_v18 = vpop.permute.xlu1 %1163 }
 0xee8   :  { %v1168_v61 = vmul.f32 %v2355_v59, %v1164_v18 }
 0xef6   :  { %v1162_v60 = vpop.permute.xlu0 %1161 }
 0xef7   :  { %v1167_v62 = vmul.f32 %v1162_v60, %v1108_v41 }
 0xef9   :  { %v1169_v30 = vadd.f32 %v1168_v61, %v1167_v62 }
 0xefa   :  { %v1166_v22 = vpop.permute.xlu0 %1165 }
 0xefb   :  { %2356 = vtanh.f32 %v1169_v30 }
 0xf05   :  { %v2357_v53 = vpop.eup %2356 }
 0xf06   :  { %v1171_v63 = vmul.f32 %v2357_v53, %v1166_v22 }
 0xf08   :  { %v1173_v1 = vpack.c.bf16 %v1171_v63, %v1171_v63 }
 0xf0a   :  { %2118 = vmatmul.mubr.bf16.vlgmr.msra.gmra.mrb[28].mxu1 %v1173_v1 }
 0xf0b   :  { %2142 = vmatpush3.bf16.msra.mxu1 %v2789_v21  ;;  %2157 = vmatprep.mubr.msk.bf16.mxu1 %vm2451_vm0, %v2450_v0 }
 0xf0c   :  { %2143 = vmatprep.subr.bf16.mxu1 %v2450_v0 }
 0xf0f   :  { %2144 = vmatpush3.bf16.msra.mxu1 %v2795_v27 }
 0xf10   :  { %2145 = vmatprep.subr.bf16.mxu1 %v2450_v0 }
 0xf13   :  { %2146 = vmatpush3.bf16.msra.mxu1 %v2799_v28 }
 0xf14   :  { %2147 = vmatprep.subr.bf16.mxu1 %v2450_v0 }
 0xf17   :  { %2148 = vmatpush3.bf16.msra.mxu1 %v2803_v29 }
 0xf18   :  { %2149 = vmatprep.subr.bf16.mxu1 %v2450_v0 }
 0xf1b   :  { %2150 = vmatpush3.bf16.msra.mxu1 %v2807_v31 }
 0xf1c   :  { %2151 = vmatprep.subr.bf16.mxu1 %v2450_v0 }
 0xf1f   :  { %2152 = vmatpush3.bf16.msra.mxu1 %v2811_v56 }
 0xf20   :  { %2153 = vmatprep.subr.bf16.mxu1 %v2450_v0 }
 0xf23   :  { %2154 = vmatpush3.bf16.msra.mxu1 %v2815_v32 }
 0xf24   :  { %2155 = vmatprep.subr.bf16.mxu1 %v2450_v0 }
 0xf27   :  { %2156 = vmatpush3.bf16.msra.mxu1 %v2819_v33 }
 0xf28   :  { %2181 = vmatprep.subr.bf16.mxu1 %v2450_v0 }
 0xfdd   :  { %v1208_v5 = vpop.f32.mrb[28].mxu1 }
 0xfde   :  { %v1214_v7 = vadd.f32 %v1208_v5, %v915_v3  ;;  %v2119_v9 = vpop.f32.mrb[29].mxu1  ;;  %v928_v3 = vadd.f32 %v2905_v16, %v2874_v43 }
 0xfdf   :  { %v1211_v12 = vpop.f32.mrb[30].mxu1 }
 0xfe0   :  { %v1642_v13 = vmul.f32 -1.442695, %v1214_v7  ;;  %2358 = vtanh.f32 %v1214_v7  ;;  %v2120_v15 = vpop.f32.mrb[31].mxu1 }
 0xfe2   :  { %2360 = vpow2.f32 %v1642_v13 }
 0xfea   :  { %v2359_v45 = vpop.eup %2358 }
 0xfeb   :  { %1224 = vrot.lane.b32.xlu0 %v2359_v45, %s2447_s7 }
 0xfec   :  { %v2361_v11 = vpop.eup %2360 }
 0xfed   :  { %v1218_v36 = vadd.f32 1.0, %v2361_v11 }
 0xfef   :  { %2362 = vrcp.f32 %v1218_v36 }
 0xff9   :  { %v2363_v37 = vpop.eup %2362 }
 0xffa   :  { %1222 = vrot.lane.b32.xlu1 %v2363_v37, %s2454_s17 }
 0xffe   :  { %1226 = vrot.lane.b32.xlu1 %v2363_v37, %s2453_s16 }
0x105d   :  { %v1225_v20 = vpop.permute.xlu0 %1224 }
0x105e   :  { %v1229_v25 = vmul.f32 %v2363_v37, %v1225_v20 }
0x106c   :  { %v1223_v38 = vpop.permute.xlu1 %1222 }
0x106d   :  { %v1228_v2 = vmul.f32 %v1223_v38, %v1169_v30 }
0x106f   :  { %v1230_v4 = vadd.f32 %v1229_v25, %v1228_v2 }
0x1070   :  { %v1227_v23 = vpop.permute.xlu1 %1226 }
0x1071   :  { %2364 = vtanh.f32 %v1230_v4 }
0x107b   :  { %v2365_v6 = vpop.eup %2364 }
0x107c   :  { %v1232_v8 = vmul.f32 %v2365_v6, %v1227_v23 }
0x107e   :  { %v1234_v10 = vpack.c.bf16 %v1232_v8, %v1232_v8 }
0x1080   :  { %2138 = vmatmul.mubr.bf16.vlgmr.msra.gmra.mrb[32].mxu0 %v1234_v10  ;;  %v931_v10 = vadd.f32 %v2909_v34, %v2874_v43 }
0x1081   :  { %2162 = vmatpush3.bf16.msra.mxu0 %v2789_v21  ;;  %2177 = vmatprep.mubr.msk.bf16.mxu0 %vm2451_vm0, %v2450_v0 }
0x1082   :  { %2163 = vmatprep.subr.bf16.mxu0 %v2450_v0 }
0x1085   :  { %2164 = vmatpush3.bf16.msra.mxu0 %v2795_v27 }
0x1086   :  { %2165 = vmatprep.subr.bf16.mxu0 %v2450_v0 }
0x1089   :  { %2166 = vmatpush3.bf16.msra.mxu0 %v2799_v28 }
0x108a   :  { %2167 = vmatprep.subr.bf16.mxu0 %v2450_v0 }
0x108d   :  { %2168 = vmatpush3.bf16.msra.mxu0 %v2803_v29 }
0x108e   :  { %2169 = vmatprep.subr.bf16.mxu0 %v2450_v0 }
0x1091   :  { %2170 = vmatpush3.bf16.msra.mxu0 %v2807_v31 }
0x1092   :  { %2171 = vmatprep.subr.bf16.mxu0 %v2450_v0 }
0x1095   :  { %2172 = vmatpush3.bf16.msra.mxu0 %v2811_v56 }
0x1096   :  { %2173 = vmatprep.subr.bf16.mxu0 %v2450_v0 }
0x1099   :  { %2174 = vmatpush3.bf16.msra.mxu0 %v2815_v32 }
0x109a   :  { %2175 = vmatprep.subr.bf16.mxu0 %v2450_v0 }
0x109d   :  { %2176 = vmatpush3.bf16.msra.mxu0 %v2819_v33 }
0x109e   :  { %2201 = vmatprep.subr.bf16.mxu0 %v2450_v0 }
0x1153   :  { %v1269_v26 = vpop.f32.mrb[32].mxu0 }
0x1154   :  { %v1275_v14 = vadd.f32 %v1269_v26, %v920_v39  ;;  %v2139_v40 = vpop.f32.mrb[33].mxu0 }
0x1155   :  { %v1272_v17 = vpop.f32.mrb[34].mxu0  ;;  %v2262_v40 = vld [vmem:[%s3062_s4] sm:$0xff]  }
0x1156   :  { %v1643_v41 = vmul.f32 -1.442695, %v1275_v14  ;;  %2366 = vtanh.f32 %v1275_v14  ;;  %v2140_v19 = vpop.f32.mrb[35].mxu0 }
0x1158   :  { %2368 = vpow2.f32 %v1643_v41 }
0x1160   :  { %v2367_v42 = vpop.eup %2366 }
0x1161   :  { %1285 = vrot.lane.b32.xlu1 %v2367_v42, %s2447_s7  ;;  %v2263_v42 = vld [vmem:[%s3062_s4 + $0x8] sm:$0xff]  }
0x1162   :  { %v2369_v58 = vpop.eup %2368 }
0x1163   :  { %v1279_v24 = vadd.f32 1.0, %v2369_v58  ;;  %v2265_v58 = vld [vmem:[%s3062_s4 + $0x18] sm:$0xff]  }
0x1165   :  { %2370 = vrcp.f32 %v1279_v24 }
0x116f   :  { %v2371_v57 = vpop.eup %2370 }
0x1170   :  { %1283 = vrot.lane.b32.xlu0 %v2371_v57, %s2454_s17 }
0x1174   :  { %1287 = vrot.lane.b32.xlu0 %v2371_v57, %s2453_s16 }
0x11d3   :  { %v1286_v55 = vpop.permute.xlu1 %1285 }
0x11d4   :  { %v1290_v46 = vmul.f32 %v2371_v57, %v1286_v55  ;;  %v2266_v55 = vld [vmem:[%s3062_s4 + $0x20] sm:$0xff]  }
0x11e2   :  { %v1284_v44 = vpop.permute.xlu0 %1283 }
0x11e3   :  { %v1289_v47 = vmul.f32 %v1284_v44, %v1230_v4  ;;  %v2267_v44 = vld [vmem:[%s3062_s4 + $0x28] sm:$0xff]  }
0x11e5   :  { %v1291_v48 = vadd.f32 %v1290_v46, %v1289_v47  ;;  %v2268_v46 = vld [vmem:[%s3062_s4 + $0x30] sm:$0xff]  }
0x11e6   :  { %v1288_v50 = vpop.permute.xlu0 %1287 }
0x11e7   :  { %2372 = vtanh.f32 %v1291_v48 }
0x11f1   :  { %v2373_v49 = vpop.eup %2372 }
0x11f2   :  { %v1293_v51 = vmul.f32 %v2373_v49, %v1288_v50 }
0x11f4   :  { %v1295_v52 = vpack.c.bf16 %v1293_v51, %v1293_v51 }
0x11f6   :  { %2158 = vmatmul.mubr.bf16.vlgmr.msra.gmra.mrb[32].mxu1 %v1295_v52 }
0x11f7   :  { %2182 = vmatpush3.bf16.msra.mxu1 %v2789_v21  ;;  %2197 = vmatprep.mubr.msk.bf16.mxu1 %vm2451_vm0, %v2450_v0  ;;  %v923_v21 = vadd.f32 %v2874_v43, %v2911_v35  ;;  %v2264_v43 = vld [vmem:[%s3062_s4 + $0x10] sm:$0xff]  }
0x11f8   :  { %2183 = vmatprep.subr.bf16.mxu1 %v2450_v0 }
0x11fb   :  { %2184 = vmatpush3.bf16.msra.mxu1 %v2795_v27 }
0x11fc   :  { %2185 = vmatprep.subr.bf16.mxu1 %v2450_v0 }
0x11ff   :  { %2186 = vmatpush3.bf16.msra.mxu1 %v2799_v28 }
0x1200   :  { %2187 = vmatprep.subr.bf16.mxu1 %v2450_v0 }
0x1203   :  { %2188 = vmatpush3.bf16.msra.mxu1 %v2803_v29 }
0x1204   :  { %2189 = vmatprep.subr.bf16.mxu1 %v2450_v0 }
0x1207   :  { %2190 = vmatpush3.bf16.msra.mxu1 %v2807_v31 }
0x1208   :  { %2191 = vmatprep.subr.bf16.mxu1 %v2450_v0 }
0x120b   :  { %2192 = vmatpush3.bf16.msra.mxu1 %v2811_v56 }
0x120c   :  { %2193 = vmatprep.subr.bf16.mxu1 %v2450_v0 }
0x120f   :  { %2194 = vmatpush3.bf16.msra.mxu1 %v2815_v32 }
0x1210   :  { %2195 = vmatprep.subr.bf16.mxu1 %v2450_v0 }
0x1213   :  { %2196 = vmatpush3.bf16.msra.mxu1 %v2819_v33 }
0x12c9   :  { %v1330_v27 = vpop.f32.mrb[32].mxu1 }
0x12ca   :  { %v1336_v28 = vadd.f32 %v1330_v27, %v923_v21  ;;  %v2159_v29 = vpop.f32.mrb[33].mxu1 }
0x12cb   :  { %v1333_v54 = vpop.f32.mrb[34].mxu1 }
0x12cc   :  { %v1644_v31 = vmul.f32 -1.442695, %v1336_v28  ;;  %2374 = vtanh.f32 %v1336_v28  ;;  %v2160_v59 = vpop.f32.mrb[35].mxu1 }
0x12ce   :  { %2376 = vpow2.f32 %v1644_v31 }
0x12d6   :  { %v2375_v56 = vpop.eup %2374 }
0x12d7   :  { %1346 = vrot.lane.b32.xlu0 %v2375_v56, %s2447_s7 }
0x12d8   :  { %v2377_v18 = vpop.eup %2376 }
0x12d9   :  { %v1340_v32 = vadd.f32 1.0, %v2377_v18 }
0x12db   :  { %2378 = vrcp.f32 %v1340_v32 }
0x12e5   :  { %v2379_v60 = vpop.eup %2378 }
0x12e6   :  { %1344 = vrot.lane.b32.xlu1 %v2379_v60, %s2454_s17 }
0x12ea   :  { %1348 = vrot.lane.b32.xlu1 %v2379_v60, %s2453_s16 }
0x1349   :  { %v1347_v33 = vpop.permute.xlu0 %1346 }
0x134a   :  { %v1351_v61 = vmul.f32 %v2379_v60, %v1347_v33 }
0x1358   :  { %v1345_v35 = vpop.permute.xlu1 %1344 }
0x1359   :  { %v1350_v62 = vmul.f32 %v1345_v35, %v1291_v48  ;;  %v2269_v48 = vld [vmem:[%s3062_s4 + $0x38] sm:$0xff]  }
0x135b   :  { %v1352_v30 = vadd.f32 %v1351_v61, %v1350_v62 }
0x135c   :  { %v1349_v22 = vpop.permute.xlu1 %1348 }
0x135d   :  { %2380 = vtanh.f32 %v1352_v30 }
0x1367   :  { %v2381_v53 = vpop.eup %2380 }
0x1368   :  { %v1354_v63 = vmul.f32 %v2381_v53, %v1349_v22 }
0x136a   :  { %v1356_v1 = vpack.c.bf16 %v1354_v63, %v1354_v63 }
0x136c   :  { %2178 = vmatmul.mubr.bf16.vlgmr.msra.gmra.mrb[36].mxu0 %v1356_v1 }
0x136d   :  { %2217 = vmatprep.mubr.msk.bf16.mxu0 %vm2451_vm0, %v2450_v0  ;;  %2202 = vmatpush3.bf16.msra.mxu0 %v2262_v40 }
0x136e   :  { %2203 = vmatprep.subr.bf16.mxu0 %v2450_v0 }
0x1371   :  { %2204 = vmatpush3.bf16.msra.mxu0 %v2263_v42 }
0x1372   :  { %2205 = vmatprep.subr.bf16.mxu0 %v2450_v0 }
0x1375   :  { %2206 = vmatpush3.bf16.msra.mxu0 %v2264_v43 }
0x1376   :  { %2207 = vmatprep.subr.bf16.mxu0 %v2450_v0 }
0x1379   :  { %2208 = vmatpush3.bf16.msra.mxu0 %v2265_v58 }
0x137a   :  { %2209 = vmatprep.subr.bf16.mxu0 %v2450_v0 }
0x137d   :  { %2210 = vmatpush3.bf16.msra.mxu0 %v2266_v55 }
0x137e   :  { %2211 = vmatprep.subr.bf16.mxu0 %v2450_v0 }
0x1381   :  { %2212 = vmatpush3.bf16.msra.mxu0 %v2267_v44 }
0x1382   :  { %2213 = vmatprep.subr.bf16.mxu0 %v2450_v0 }
0x1385   :  { %2214 = vmatpush3.bf16.msra.mxu0 %v2268_v46 }
0x1386   :  { %2215 = vmatprep.subr.bf16.mxu0 %v2450_v0  ;;  %v1647_v0 = vld [vmem:[%s3063_s5] ss:$0 sm:$0xff] }
0x1389   :  { %2216 = vmatpush3.bf16.msra.mxu0 %v2269_v48 }
0x143f   :  { %v1391_v5 = vpop.f32.mrb[36].mxu0 }
0x1440   :  { %v1397_v7 = vadd.f32 %v1391_v5, %v928_v3  ;;  %v2179_v9 = vpop.f32.mrb[37].mxu0 }
0x1441   :  { %v1394_v12 = vpop.f32.mrb[38].mxu0 }
0x1442   :  { %v1645_v13 = vmul.f32 -1.442695, %v1397_v7  ;;  %2382 = vtanh.f32 %v1397_v7  ;;  %v2180_v15 = vpop.f32.mrb[39].mxu0 }
0x1444   :  { %2384 = vpow2.f32 %v1645_v13 }
0x144c   :  { %v2383_v45 = vpop.eup %2382 }
0x144d   :  { %1407 = vrot.lane.b32.xlu1 %v2383_v45, %s2447_s7 }
0x144e   :  { %v2385_v11 = vpop.eup %2384 }
0x144f   :  { %v1401_v36 = vadd.f32 1.0, %v2385_v11 }
0x1451   :  { %2386 = vrcp.f32 %v1401_v36 }
0x145b   :  { %v2387_v37 = vpop.eup %2386 }
0x145c   :  { %1405 = vrot.lane.b32.xlu0 %v2387_v37, %s2454_s17 }
0x1460   :  { %1409 = vrot.lane.b32.xlu0 %v2387_v37, %s2453_s16 }
0x14bf   :  { %v1408_v16 = vpop.permute.xlu1 %1407 }
0x14c0   :  { %v1412_v38 = vmul.f32 %v2387_v37, %v1408_v16 }
0x14ce   :  { %v1406_v20 = vpop.permute.xlu0 %1405 }
0x14cf   :  { %v1411_v25 = vmul.f32 %v1406_v20, %v1352_v30 }
0x14d1   :  { %v1413_v2 = vadd.f32 %v1412_v38, %v1411_v25 }
0x14d2   :  { %v1410_v6 = vpop.permute.xlu0 %1409 }
0x14d3   :  { %2388 = vtanh.f32 %v1413_v2 }
0x14dd   :  { %v2389_v4 = vpop.eup %2388 }
0x14de   :  { %v1415_v23 = vmul.f32 %v2389_v4, %v1410_v6 }
0x14e0   :  { %v1417_v8 = vpack.c.bf16 %v1415_v23, %v1415_v23 }
0x14e2   :  { %2198 = vmatmul.mubr.bf16.vlgmr.msra.gmra.mrb[36].mxu1 %v1417_v8 }
0x15b5   :  { %v1452_v39 = vpop.f32.mrb[36].mxu1 }
0x15b6   :  { %v1458_v26 = vadd.f32 %v1452_v39, %v931_v10  ;;  %v2199_v14 = vpop.f32.mrb[37].mxu1 }
0x15b7   :  { %v1455_v17 = vpop.f32.mrb[38].mxu1 }
0x15b8   :  { %v1646_v41 = vmul.f32 -1.442695, %v1458_v26  ;;  %2390 = vtanh.f32 %v1458_v26  ;;  %v2200_v19 = vpop.f32.mrb[39].mxu1 }
0x15ba   :  { %2392 = vpow2.f32 %v1646_v41 }
0x15c2   :  { %v2391_v34 = vpop.eup %2390 }
0x15c3   :  { %1468 = vrot.lane.b32.xlu0 %v2391_v34, %s2447_s7 }
0x15c4   :  { %v2393_v24 = vpop.eup %2392 }
0x15c5   :  { %v1462_v57 = vadd.f32 1.0, %v2393_v24 }
0x15c7   :  { %2394 = vrcp.f32 %v1462_v57 }
0x15d1   :  { %v2395_v47 = vpop.eup %2394 }
0x15d2   :  { %1466 = vrot.lane.b32.xlu1 %v2395_v47, %s2454_s17 }
0x15d6   :  { %1470 = vrot.lane.b32.xlu1 %v2395_v47, %s2453_s16 }
0x1635   :  { %v1469_v49 = vpop.permute.xlu0 %1468 }
0x1636   :  { %v1473_v51 = vmul.f32 %v2395_v47, %v1469_v49 }
0x1644   :  { %v1467_v50 = vpop.permute.xlu1 %1466 }
0x1645   :  { %v1472_v52 = vmul.f32 %v1467_v50, %v1413_v2 }
0x1647   :  { %v1474_v21 = vadd.f32 %v1473_v51, %v1472_v52 }
0x1648   :  { %v1471_v28 = vpop.permute.xlu1 %1470 }
0x1649   :  { %2396 = vtanh.f32 %v1474_v21 }
0x1653   :  { %v2397_v27 = vpop.eup %2396 }
0x1654   :  { %v1476_v29 = vmul.f32 %v2397_v27, %v1471_v28 }
0x1656   :  { %v1477_v54 = vpack.c.bf16 %v1476_v29, %v1476_v29 }
0x1658   :  { %2218 = vmatmul.mubr.bf16.vlgmr.msra.gmra.mrb[40].mxu0 %v1477_v54 }
0x172b   :  { %v1583_v31 = vpop.f32.mrb[40].mxu0 }
0x172c   :  { %v1584_v59 = vadd.f32 %v1647_v0, %v1583_v31  ;;  %v2219_v56 = vpop.f32.mrb[41].mxu0 }
0x172d   :  { %v1586_v18 = vpop.f32.mrb[42].mxu0 }
0x172e   :  { %1589 = vst [vmem:[%s3064_s6] sm:$0xff] %v1584_v59  ;;  %v2220_v32 = vpop.f32.mrb[43].mxu0 }
0x172f   :  { %1594 = vsyncpa [#allocation5], 1 }
0x1730   :  { %1595 = vsyncpa [#allocation7], 1 }

</bundles_post_ra>
